<compile_context>
chip_gen: v5e
topology: v5e:2x2
jax: 0.10.0
libtpu: 0.0.40
codegen_flags: <defaults>
</compile_context>

<pallas_src>
import functools

import jax
import jax.numpy as jnp
from jax.experimental import pallas as pl
from jax.experimental.pallas import tpu as pltpu


def _round_up(x, m):
    return ((x + m - 1) // m) * m


def _vmem_capacity_bytes():
    try:
        return int(pltpu.get_tpu_info().vmem_capacity_bytes)
    except Exception:
        return 128 * 1024 * 1024


def _tile_vmem_bytes(tm, D, K, enc_itemsize):
    f32 = 4
    tiles = 2 * tm * D * f32              # x tile (double buffered)
    tiles += 2 * tm * D * f32             # quantized out tile
    tiles += 2 * tm * K * enc_itemsize    # encodings out tile
    temps = (3 * tm * K + 2 * tm * D) * f32   # dist / one-hot / diff temporaries
    resident = 2 * (2 * K * D + 2 * K) * f32  # W, W^T, 0.5|w|^2 (budget 2 buffers each)
    return tiles + temps + resident


def _make_codebook_kernel(rows, tm, K, D, n_grid):
    need_mask = (n_grid * tm) != rows  # ragged last tile -> mask garbage edge rows

    def kernel(x_ref, w_ref, wt_ref, wsqh_ref, q_ref, enc_ref, sq_ref, cnt_ref):
        x = x_ref[...]                                               # (tm, D) f32

        # argmin_k |x - w_k|^2 == argmin_k (0.5*|w_k|^2 - x.w_k): the |x|^2 term is a
        # per-row constant and the factor 2 is a positive scale, so both are dropped.
        xw = jnp.dot(x, wt_ref[...], preferred_element_type=jnp.float32)   # (tm, K)
        key = wsqh_ref[...] - xw                                     # (tm, K)

        col = jax.lax.broadcasted_iota(jnp.int32, (1, K), 1)         # (1, K)
        min_key = jnp.min(key, axis=1, keepdims=True)                # (tm, 1)
        # first index of the minimum (matches torch.argmin tie-breaking)
        idx = jnp.min(jnp.where(key == min_key, col, K), axis=1, keepdims=True)  # (tm, 1)
        enc = (col == idx).astype(jnp.float32)                       # (tm, K) one-hot

        if need_mask:
            i = pl.program_id(0)
            row = jax.lax.broadcasted_iota(jnp.int32, (tm, 1), 0) + i * tm
            valid = row < rows                                        # (tm, 1) bool
            enc = jnp.where(valid, enc, 0.0)

        quantized = jnp.dot(enc, w_ref[...], preferred_element_type=jnp.float32)  # (tm, D)

        diff = quantized - x
        if need_mask:
            diff = jnp.where(valid, diff, 0.0)   # edge-block reads of x are undefined
        sq = jnp.sum(jnp.sum(diff * diff, axis=1, keepdims=True), axis=0, keepdims=True)

        sq_ref[...] = sq.reshape(1, 1, 1)                            # per-tile partial
        cnt_ref[...] = jnp.sum(enc, axis=0, keepdims=True).reshape(1, 1, K)

        q_ref[...] = quantized.astype(q_ref.dtype)
        enc_ref[...] = enc.astype(enc_ref.dtype)

    return kernel


@functools.partial(jax.jit,
                   static_argnames=("commitment_cost", "tile_rows", "encodings_dtype"))
def codebook_forward(inputs, embedding_weight, *, commitment_cost,
                     tile_rows=1024, encodings_dtype=jnp.bfloat16):
    """inputs: (N, D) float32, embedding_weight: (K, D) float32.
    Returns (loss, quantized (N, D), perplexity, encodings (N, K))."""
    rows, D = inputs.shape
    K, Dw = embedding_weight.shape
    assert D == Dw

    enc_dtype = jnp.dtype(encodings_dtype)

    # Balanced row tile: spread padding over all grid steps instead of one nearly-dead
    # trailing tile; respect sublane granularity of the input dtype; clamp to VMEM budget.
    sub = {4: 8, 2: 16, 1: 32}.get(jnp.dtype(inputs.dtype).itemsize, 8)
    n_tiles = max(1, pl.cdiv(rows, int(tile_rows)))
    tm = _round_up(pl.cdiv(rows, n_tiles), sub)

    cap = _vmem_capacity_bytes()
    while _tile_vmem_bytes(tm, D, K, enc_dtype.itemsize) > 0.5 * cap and tm > sub:
        tm = max(sub, _round_up(tm // 2, sub))
    n_grid = pl.cdiv(rows, tm)

    # Grid-invariant precompute (resident in VMEM): W^T and 0.5*|w|^2.
    wT = embedding_weight.T                                           # (D, K)
    wsq_half = 0.5 * jnp.sum(embedding_weight * embedding_weight, axis=1).reshape(1, K)

    kernel = _make_codebook_kernel(rows, tm, K, D, n_grid)

    vmem_limit = int(min(max(1.5 * _tile_vmem_bytes(tm, D, K, enc_dtype.itemsize),
                             32 * 2**20),
                         0.72 * cap))

    quantized, encodings, sq_part, cnt_part = pl.pallas_call(
        kernel,
        out_shape=(
            jax.ShapeDtypeStruct((rows, D), inputs.dtype),        # quantized (STE value)
            jax.ShapeDtypeStruct((rows, K), enc_dtype),           # one-hot encodings
            jax.ShapeDtypeStruct((n_grid, 1, 1), jnp.float32),    # per-tile sum sq residual
            jax.ShapeDtypeStruct((n_grid, 1, K), jnp.float32),    # per-tile code counts
        ),
        grid_spec=pltpu.PrefetchScalarGridSpec(
            num_scalar_prefetch=0,
            grid=(n_grid,),
            in_specs=[
                pl.BlockSpec((tm, D), lambda i: (i, 0)),   # x tile
                pl.BlockSpec((K, D), lambda i: (0, 0)),    # W        (resident)
                pl.BlockSpec((D, K), lambda i: (0, 0)),    # W^T      (resident)
                pl.BlockSpec((1, K), lambda i: (0, 0)),    # 0.5|w|^2 (resident)
            ],
            out_specs=[
                pl.BlockSpec((tm, D), lambda i: (i, 0)),       # quantized tile
                pl.BlockSpec((tm, K), lambda i: (i, 0)),       # encodings tile
                pl.BlockSpec((1, 1, 1), lambda i: (i, 0, 0)),  # per-tile sq partial
                pl.BlockSpec((1, 1, K), lambda i: (i, 0, 0)),  # per-tile count partial
            ],
        ),
        compiler_params=pltpu.CompilerParams(
            # Per-tile partial outputs -> row axis is independent -> megacore-shardable.
            dimension_semantics=("parallel",),
            vmem_limit_bytes=vmem_limit,
        ),
    )(inputs, embedding_weight, wT, wsq_half)

    # Tiny final reductions (negligible HBM traffic) done in the wrapper.
    mse = jnp.sum(sq_part) / float(rows * D)
    loss = (1.0 + float(commitment_cost)) * mse    # e_latent == q_latent in forward value
    avg = jnp.sum(cnt_part[:, 0, :], axis=0) / float(rows)
    perplexity = jnp.exp(-jnp.sum(avg * jnp.log(avg + 1e-10)))
    return loss, quantized, perplexity, encodings


def reference_forward(inputs, w, commitment_cost):
    distances = (jnp.sum(inputs ** 2, axis=1, keepdims=True)
                 + jnp.sum(w ** 2, axis=1)
                 - 2.0 * inputs @ w.T)
    idx = jnp.argmin(distances, axis=1)
    enc = jax.nn.one_hot(idx, w.shape[0], dtype=jnp.float32)
    quantized = enc @ w
    e_latent = jnp.mean((quantized - inputs) ** 2)
    q_latent = jnp.mean((quantized - inputs) ** 2)
    loss = q_latent + commitment_cost * e_latent
    avg = jnp.mean(enc, axis=0)
    perplexity = jnp.exp(-jnp.sum(avg * jnp.log(avg + 1e-10)))
    return loss, quantized, perplexity, enc


def _check(name, inputs, w, commitment_cost, tile_rows):
    loss, quantized, perp, enc = codebook_forward(
        inputs, w, commitment_cost=commitment_cost, tile_rows=tile_rows)
    quantized = jax.block_until_ready(quantized)

    r_loss, r_q, r_perp, r_enc = reference_forward(inputs, w, commitment_cost)
    assert quantized.shape == r_q.shape and enc.shape == r_enc.shape
    assert jnp.allclose(quantized, r_q, atol=1e-5, rtol=1e-5), name
    # bf16 encodings hold 0/1 exactly -> value-identical to the f32 reference one-hot.
    assert jnp.array_equal(enc.astype(jnp.float32), r_enc), name
    assert jnp.allclose(loss, r_loss, atol=1e-5, rtol=1e-5), name
    assert jnp.allclose(perp, r_perp, atol=1e-4, rtol=1e-4), name


if __name__ == "__main__":
    key = jax.random.PRNGKey(0)
    k1, k2, k3, k4 = jax.random.split(key, 4)

    # Test 1: small "image latent" batch: batch=2, 8x8 spatial positions flattened
    #   -> N=128 vectors of dim 64, codebook with 512 entries.
    N1, D1, K1 = 2 * 8 * 8, 64, 512
    x1 = jax.random.normal(k1, (N1, D1), jnp.float32)
    w1 = jax.random.normal(k2, (K1, D1), jnp.float32)
    _check("test1", x1, w1, commitment_cost=0.25, tile_rows=1024)

    # Test 2: ragged row count (exercises cdiv grid + edge-block write masking,
    #   no wrapper pad / slice passes).
    N2, D2, K2 = 100, 32, 256
    x2 = jax.random.normal(k3, (N2, D2), jnp.float32)
    w2 = jax.random.normal(k4, (K2, D2), jnp.float32)
    _check("test2", x2, w2, commitment_cost=0.25, tile_rows=64)

    print("KERNEL_OK")
</pallas_src>

<mosaic_0001>
module attributes {stable_mosaic.version = 11 : i64} {
  func.func @kernel(%arg0: i32, %arg1: memref<128x64xf32, #tpu.memory_space<vmem>>, %arg2: memref<512x64xf32, #tpu.memory_space<vmem>>, %arg3: memref<64x512xf32, #tpu.memory_space<vmem>>, %arg4: memref<1x512xf32, #tpu.memory_space<vmem>>, %arg5: memref<128x64xf32, #tpu.memory_space<vmem>>, %arg6: memref<128x512xbf16, #tpu.memory_space<vmem>>, %arg7: memref<1x1x1xf32, #tpu.memory_space<vmem>>, %arg8: memref<1x1x512xf32, #tpu.memory_space<vmem>>) attributes {dimension_semantics = [#tpu.dimension_semantics<parallel>], iteration_bounds = array<i64: 1>, scalar_prefetch = 0 : i64, scratch_operands = 0 : i64, tpu.core_type = #tpu.core_type<tc>, window_params = [{transform_indices = @transform_0, window_bounds = array<i64: 128, 64>}, {pipeline_mode = #tpu.pipeline_mode<synchronous>, transform_indices = @transform_1, window_bounds = array<i64: 512, 64>}, {pipeline_mode = #tpu.pipeline_mode<synchronous>, transform_indices = @transform_2, window_bounds = array<i64: 64, 512>}, {pipeline_mode = #tpu.pipeline_mode<synchronous>, transform_indices = @transform_3, window_bounds = array<i64: 1, 512>}, {transform_indices = @transform_4, window_bounds = array<i64: 128, 64>}, {transform_indices = @transform_5, window_bounds = array<i64: 128, 512>}, {transform_indices = @transform_6, window_bounds = array<i64: 1, 1, 1>}, {transform_indices = @transform_7, window_bounds = array<i64: 1, 1, 512>}]} {
    %c0 = arith.constant 0 : index
    %c0_0 = arith.constant 0 : index
    %0 = vector.load %arg1[%c0, %c0_0] : memref<128x64xf32, #tpu.memory_space<vmem>>, vector<128x64xf32>
    %c0_1 = arith.constant 0 : index
    %c0_2 = arith.constant 0 : index
    %1 = vector.load %arg3[%c0_1, %c0_2] : memref<64x512xf32, #tpu.memory_space<vmem>>, vector<64x512xf32>
    %cst = arith.constant dense<0.000000e+00> : vector<128x512xf32>
    %2 = tpu.matmul %0, %1, %cst {dimension_numbers = #tpu.dot_dimension_numbers<[1], [0], [0], [1], [0, 0, 1, 1], [], []>} : vector<128x64xf32>, vector<64x512xf32>, vector<128x512xf32> -> vector<128x512xf32>
    %c0_3 = arith.constant 0 : index
    %c0_4 = arith.constant 0 : index
    %3 = vector.load %arg4[%c0_3, %c0_4] : memref<1x512xf32, #tpu.memory_space<vmem>>, vector<1x512xf32>
    %4 = vector.broadcast %3 : vector<1x512xf32> to vector<128x512xf32>
    %5 = arith.subf %4, %2 : vector<128x512xf32>
    %6 = tpu.iota {dimensions = array<i32: 1>} : vector<1x512xi32>
    %cst_5 = arith.constant dense<0x7F800000> : vector<128xf32>
    %7 = vector.multi_reduction <minimumf>, %5, %cst_5 [1] : vector<128x512xf32> to vector<128xf32>
    %8 = vector.shape_cast %7 : vector<128xf32> to vector<128x1xf32>
    %9 = vector.broadcast %8 : vector<128x1xf32> to vector<128x512xf32>
    %10 = arith.cmpf oeq, %5, %9 : vector<128x512xf32>
    %c512_i32 = arith.constant 512 : i32
    %11 = vector.shape_cast %6 : vector<1x512xi32> to vector<1x512xi32>
    %12 = vector.broadcast %11 : vector<1x512xi32> to vector<128x512xi32>
    %13 = vector.broadcast %c512_i32 : i32 to vector<128x512xi32>
    %14 = arith.select %10, %12, %13 : vector<128x512xi1>, vector<128x512xi32>
    %cst_6 = arith.constant dense<2147483647> : vector<128xi32>
    %15 = vector.multi_reduction <minsi>, %14, %cst_6 [1] : vector<128x512xi32> to vector<128xi32>
    %16 = vector.shape_cast %15 : vector<128xi32> to vector<128x1xi32>
    %17 = vector.broadcast %6 : vector<1x512xi32> to vector<128x512xi32>
    %18 = vector.broadcast %16 : vector<128x1xi32> to vector<128x512xi32>
    %19 = arith.cmpi eq, %17, %18 : vector<128x512xi32>
    %20 = arith.extui %19 : vector<128x512xi1> to vector<128x512xi32>
    %21 = arith.sitofp %20 : vector<128x512xi32> to vector<128x512xf32>
    %c0_7 = arith.constant 0 : index
    %c0_8 = arith.constant 0 : index
    %22 = vector.load %arg2[%c0_7, %c0_8] : memref<512x64xf32, #tpu.memory_space<vmem>>, vector<512x64xf32>
    %cst_9 = arith.constant dense<0.000000e+00> : vector<128x64xf32>
    %23 = tpu.matmul %21, %22, %cst_9 {dimension_numbers = #tpu.dot_dimension_numbers<[1], [0], [0], [1], [0, 0, 1, 1], [], []>} : vector<128x512xf32>, vector<512x64xf32>, vector<128x64xf32> -> vector<128x64xf32>
    %24 = arith.subf %23, %0 : vector<128x64xf32>
    %25 = arith.mulf %24, %24 : vector<128x64xf32>
    %cst_10 = arith.constant dense<0.000000e+00> : vector<128xf32>
    %26 = vector.multi_reduction <add>, %25, %cst_10 [1] : vector<128x64xf32> to vector<128xf32>
    %27 = vector.shape_cast %26 : vector<128xf32> to vector<128x1xf32>
    %cst_11 = arith.constant dense<0.000000e+00> : vector<1xf32>
    %28 = vector.multi_reduction <add>, %27, %cst_11 [0] : vector<128x1xf32> to vector<1xf32>
    %29 = vector.shape_cast %28 : vector<1xf32> to vector<1x1xf32>
    %30 = vector.shape_cast %29 : vector<1x1xf32> to vector<1x1x1xf32>
    %c0_12 = arith.constant 0 : index
    %c0_13 = arith.constant 0 : index
    %c0_14 = arith.constant 0 : index
    %31 = vector.load %arg7[%c0_12, %c0_13, %c0_14] : memref<1x1x1xf32, #tpu.memory_space<vmem>>, vector<1x1x1xf32>
    tpu.vector_store %arg7[%c0_12, %c0_13, %c0_14], %30 {strides = array<i32>} : memref<1x1x1xf32, #tpu.memory_space<vmem>>, vector<1x1x1xf32>,
    %cst_15 = arith.constant dense<0.000000e+00> : vector<512xf32>
    %32 = vector.multi_reduction <add>, %21, %cst_15 [0] : vector<128x512xf32> to vector<512xf32>
    %33 = vector.shape_cast %32 : vector<512xf32> to vector<1x512xf32>
    %34 = vector.shape_cast %33 : vector<1x512xf32> to vector<1x1x512xf32>
    %c0_16 = arith.constant 0 : index
    %c0_17 = arith.constant 0 : index
    %c0_18 = arith.constant 0 : index
    %35 = vector.load %arg8[%c0_16, %c0_17, %c0_18] : memref<1x1x512xf32, #tpu.memory_space<vmem>>, vector<1x1x512xf32>
    tpu.vector_store %arg8[%c0_16, %c0_17, %c0_18], %34 {strides = array<i32>} : memref<1x1x512xf32, #tpu.memory_space<vmem>>, vector<1x1x512xf32>,
    %c0_19 = arith.constant 0 : index
    %c0_20 = arith.constant 0 : index
    %36 = vector.load %arg5[%c0_19, %c0_20] : memref<128x64xf32, #tpu.memory_space<vmem>>, vector<128x64xf32>
    tpu.vector_store %arg5[%c0_19, %c0_20], %23 {strides = array<i32>} : memref<128x64xf32, #tpu.memory_space<vmem>>, vector<128x64xf32>,
    %37 = arith.truncf %21 : vector<128x512xf32> to vector<128x512xbf16>
    %c0_21 = arith.constant 0 : index
    %c0_22 = arith.constant 0 : index
    %38 = vector.load %arg6[%c0_21, %c0_22] : memref<128x512xbf16, #tpu.memory_space<vmem>>, vector<128x512xbf16>
    tpu.vector_store %arg6[%c0_21, %c0_22], %37 {strides = array<i32>} : memref<128x512xbf16, #tpu.memory_space<vmem>>, vector<128x512xbf16>,
    return
  }
  func.func @transform_0(%arg0: i32) -> (i32, i32) {
    %c0_i32 = arith.constant 0 : i32
    %c0_i32_0 = arith.constant 0 : i32
    return %arg0, %c0_i32 : i32, i32
  }
  func.func @transform_1(%arg0: i32) -> (i32, i32) {
    %c0_i32 = arith.constant 0 : i32
    %c0_i32_0 = arith.constant 0 : i32
    %c0_i32_1 = arith.constant 0 : i32
    return %c0_i32, %c0_i32_0 : i32, i32
  }
  func.func @transform_2(%arg0: i32) -> (i32, i32) {
    %c0_i32 = arith.constant 0 : i32
    %c0_i32_0 = arith.constant 0 : i32
    %c0_i32_1 = arith.constant 0 : i32
    return %c0_i32, %c0_i32_0 : i32, i32
  }
  func.func @transform_3(%arg0: i32) -> (i32, i32) {
    %c0_i32 = arith.constant 0 : i32
    %c0_i32_0 = arith.constant 0 : i32
    %c0_i32_1 = arith.constant 0 : i32
    return %c0_i32, %c0_i32_0 : i32, i32
  }
  func.func @transform_4(%arg0: i32) -> (i32, i32) {
    %c0_i32 = arith.constant 0 : i32
    %c0_i32_0 = arith.constant 0 : i32
    return %arg0, %c0_i32 : i32, i32
  }
  func.func @transform_5(%arg0: i32) -> (i32, i32) {
    %c0_i32 = arith.constant 0 : i32
    %c0_i32_0 = arith.constant 0 : i32
    return %arg0, %c0_i32 : i32, i32
  }
  func.func @transform_6(%arg0: i32) -> (i32, i32, i32) {
    %c0_i32 = arith.constant 0 : i32
    %c0_i32_0 = arith.constant 0 : i32
    %c0_i32_1 = arith.constant 0 : i32
    return %arg0, %c0_i32, %c0_i32_0 : i32, i32, i32
  }
  func.func @transform_7(%arg0: i32) -> (i32, i32, i32) {
    %c0_i32 = arith.constant 0 : i32
    %c0_i32_0 = arith.constant 0 : i32
    %c0_i32_1 = arith.constant 0 : i32
    return %arg0, %c0_i32, %c0_i32_0 : i32, i32, i32
  }
}

</mosaic_0001>

<bundles_post_ra>
// kernel: codebook_forward.1
= control target key start
LH: loop header
LB: loop body
LE: loop exit
PB: predicated region body
PF: predicated region fallthrough
CT: control target
= control target key end

     0   :  { %13 = vsyncpa [#allocation3], 0  ;;  %s3493_s0 = inlined_call_operand.vmem [shape: f32[128,64], index: 0, kind: input, shape index: {}]   ;;  %s3494_s1 = inlined_call_operand.vmem [shape: f32[512,64], index: 1, kind: input, shape index: {}]   ;;  %s3495_s2 = inlined_call_operand.vmem [shape: f32[64,512], index: 2, kind: input, shape index: {}]   ;;  %s3496_s3 = inlined_call_operand.vmem [shape: f32[1,512], index: 3, kind: input, shape index: {}]   ;;  %s3497_s4 = inlined_call_operand.vmem [shape: f32[128,64], index: 4, kind: output, shape index: {0}]   ;;  %s3498_s5 = inlined_call_operand.hbm [shape: bf16[128,512], index: 5, kind: output, shape index: {1}]   ;;  %s3499_s6 = inlined_call_operand.hbm [shape: f32[1,1,1], index: 6, kind: output, shape index: {2}]   ;;  %s3500_s7 = inlined_call_operand.vmem [shape: f32[1,1,512], index: 7, kind: output, shape index: {3}]  }
   0x1   :  { %v69_v0 = vld [vmem:[%s3495_s2 + $0xf0] sm:$0xff]  ;;  %v70_v2 = vld [vmem:[%s3495_s2 + $0xf8] sm:$0xff]  ;;  %v67_v3 = vld [vmem:[%s3495_s2 + $0xe0] sm:$0xff] }
   0x2   :  { %v65_v1 = vld [vmem:[%s3495_s2 + $0xd0] sm:$0xff]  ;;  %258 = vmatpush.msra.mxu2 %v69_v0  ;;  %323 = vmatpush.msra.mxu3 %v70_v2  ;;  %v68_v4 = vld [vmem:[%s3495_s2 + $0xe8] sm:$0xff]  ;;  %v66_v6 = vld [vmem:[%s3495_s2 + $0xd8] sm:$0xff] }
   0x3   :  { %v61_v5 = vld [vmem:[%s3495_s2 + $0xb0] sm:$0xff]  ;;  %128 = vmatpush.msra.mxu0 %v67_v3  ;;  %193 = vmatpush.msra.mxu1 %v68_v4  ;;  %v63_v7 = vld [vmem:[%s3495_s2 + $0xc0] sm:$0xff]  ;;  %v64_v8 = vld [vmem:[%s3495_s2 + $0xc8] sm:$0xff] }
   0x4   :  { %259 = vmatpush.msra.mxu2 %v65_v1  ;;  %324 = vmatpush.msra.mxu3 %v66_v6  ;;  %v62_v9 = vld [vmem:[%s3495_s2 + $0xb8] sm:$0xff]  ;;  %v59_v10 = vld [vmem:[%s3495_s2 + $0xa0] sm:$0xff]  ;;  %v57_v11 = vld [vmem:[%s3495_s2 + $0x90] sm:$0xff] }
   0x5   :  { %129 = vmatpush.msra.mxu0 %v63_v7  ;;  %194 = vmatpush.msra.mxu1 %v64_v8  ;;  %v60_v12 = vld [vmem:[%s3495_s2 + $0xa8] sm:$0xff]  ;;  %v58_v13 = vld [vmem:[%s3495_s2 + $0x98] sm:$0xff]  ;;  %v55_v14 = vld [vmem:[%s3495_s2 + $0x80] sm:$0xff] }
   0x6   :  { %260 = vmatpush.msra.mxu2 %v61_v5  ;;  %325 = vmatpush.msra.mxu3 %v62_v9  ;;  %v56_v15 = vld [vmem:[%s3495_s2 + $0x88] sm:$0xff]  ;;  %v53_v16 = vld [vmem:[%s3495_s2 + $0x70] sm:$0xff]  ;;  %v54_v17 = vld [vmem:[%s3495_s2 + $0x78] sm:$0xff] }
   0x7   :  { %130 = vmatpush.msra.mxu0 %v59_v10  ;;  %195 = vmatpush.msra.mxu1 %v60_v12  ;;  %v51_v18 = vld [vmem:[%s3495_s2 + $0x60] sm:$0xff]  ;;  %v52_v19 = vld [vmem:[%s3495_s2 + $0x68] sm:$0xff]  ;;  %v49_v20 = vld [vmem:[%s3495_s2 + $0x50] sm:$0xff] }
   0x8   :  { %261 = vmatpush.msra.mxu2 %v57_v11  ;;  %326 = vmatpush.msra.mxu3 %v58_v13  ;;  %v50_v21 = vld [vmem:[%s3495_s2 + $0x58] sm:$0xff]  ;;  %v47_v22 = vld [vmem:[%s3495_s2 + $0x40] sm:$0xff]  ;;  %v48_v23 = vld [vmem:[%s3495_s2 + $0x48] sm:$0xff] }
   0x9   :  { %131 = vmatpush.msra.mxu0 %v55_v14  ;;  %196 = vmatpush.msra.mxu1 %v56_v15  ;;  %v45_v24 = vld [vmem:[%s3495_s2 + $0x30] sm:$0xff]  ;;  %v46_v25 = vld [vmem:[%s3495_s2 + $0x38] sm:$0xff]  ;;  %v43_v26 = vld [vmem:[%s3495_s2 + $0x20] sm:$0xff] }
   0xa   :  { %262 = vmatpush.msra.mxu2 %v53_v16  ;;  %327 = vmatpush.msra.mxu3 %v54_v17  ;;  %v44_v27 = vld [vmem:[%s3495_s2 + $0x28] sm:$0xff]  ;;  %v41_v28 = vld [vmem:[%s3495_s2 + $0x10] sm:$0xff]  ;;  %v42_v29 = vld [vmem:[%s3495_s2 + $0x18] sm:$0xff] }
   0xb   :  { %132 = vmatpush.msra.mxu0 %v51_v18  ;;  %197 = vmatpush.msra.mxu1 %v52_v19 }
   0xc   :  { %263 = vmatpush.msra.mxu2 %v49_v20  ;;  %328 = vmatpush.msra.mxu3 %v50_v21 }
   0xd   :  { %133 = vmatpush.msra.mxu0 %v47_v22  ;;  %198 = vmatpush.msra.mxu1 %v48_v23 }
   0xe   :  { %14 = vsyncpa [#allocation5], 0  ;;  %264 = vmatpush.msra.mxu2 %v45_v24  ;;  %329 = vmatpush.msra.mxu3 %v46_v25  ;;  %v23_v30 = vld [vmem:[%s3493_s0] sm:$0xff]  ;;  %vm71_vm0 = vcmask 523264   ;;  %v40_v32 = vld [vmem:[%s3495_s2 + $0x8] sm:$0xff]  ;;  %s2099_s21 = smov [#allocation2]  }
   0xf   :  { %134 = vmatpush.msra.mxu0 %v43_v26  ;;  %199 = vmatpush.msra.mxu1 %v44_v27  ;;  %v39_v31 = vld [vmem:[%s3495_s2] sm:$0xff]  ;;  %v24_v33 = vld [vmem:[%s3493_s0 + $0x8] sm:$0xff]  ;;  %v25_v34 = vld [vmem:[%s3493_s0 + $0x10] sm:$0xff]  ;;  %s1795_s22 = sshll.u32 %s2099_s21, 4  ;;  %s2100_s2 = smov 256   ;;  %s1796_s22 = int_to_ptr.vmem [resolvable:$true] %s1795_s22 }
  0x10   :  { %265 = vmatpush.msra.mxu2 %v41_v28  ;;  %330 = vmatpush.msra.mxu3 %v42_v29  ;;  %v26_v35 = vld [vmem:[%s3493_s0 + $0x18] sm:$0xff]  ;;  %v27_v36 = vld [vmem:[%s3493_s0 + $0x20] sm:$0xff]  ;;  %v28_v37 = vld [vmem:[%s3493_s0 + $0x28] sm:$0xff]  ;;  %s1811_s24 = sshll.u32 %s3499_s6, 4  ;;  %s1812_s24 = int_to_ptr.hbm [resolvable:$true] %s1811_s24 }
  0x11   :  { %1863 = vmatmul.msk.f32.vlgmr.msra.gmra.mxu2 %vm71_vm0, %v23_v30  ;;  %1879 = vmatmul.msk.f32.vlgmr.msra.gmra.mxu3 %vm71_vm0, %v23_v30  ;;  %v29_v38 = vld [vmem:[%s3493_s0 + $0x30] sm:$0xff]  ;;  %v30_v39 = vld [vmem:[%s3493_s0 + $0x38] sm:$0xff]  ;;  %v31_v40 = vld [vmem:[%s3493_s0 + $0x40] sm:$0xff] }
  0x12   :  { %135 = vmatpush.msra.mxu0 %v39_v31  ;;  %200 = vmatpush.msra.mxu1 %v40_v32  ;;  %v32_v41 = vld [vmem:[%s3493_s0 + $0x48] sm:$0xff]  ;;  %v33_v42 = vld [vmem:[%s3493_s0 + $0x50] sm:$0xff]  ;;  %v380_v43 = vld [vmem:[%s3496_s3] sm:$0xf]  ;;  %s1797_s3 = sshll.u32 %s3498_s5, 4  ;;  %s1798_s3 = int_to_ptr.hbm [resolvable:$true] %s1797_s3 }
  0x13   :  { %1831 = vmatmul.msk.f32.vlgmr.msra.gmra.mxu0 %vm71_vm0, %v23_v30  ;;  %1847 = vmatmul.msk.f32.vlgmr.msra.gmra.mxu1 %vm71_vm0, %v23_v30  ;;  %v2319_v44 = vperm.slane %v380_v43, 0  ;;  %v2321_v45 = vperm.slane %v380_v43, 1  ;;  %v34_v46 = vld [vmem:[%s3493_s0 + $0x58] sm:$0xff]  ;;  %v2336_v51 = vperm.slane %v380_v43, 2  ;;  %v2338_v52 = vperm.slane %v380_v43, 3  ;;  %v35_v58 = vld [vmem:[%s3493_s0 + $0x60] sm:$0xff] }
  0x14   :  { %v36_v6 = vld [vmem:[%s3493_s0 + $0x68] sm:$0xff]  ;;  %v37_v18 = vld [vmem:[%s3493_s0 + $0x70] sm:$0xff]  ;;  %v38_v30 = vld [vmem:[%s3493_s0 + $0x78] sm:$0xff] }
  0x19   :  { %1864 = vmatmul.msk.f32.gmra.mxu2 %vm71_vm0, %v24_v33  ;;  %1880 = vmatmul.msk.f32.gmra.mxu3 %vm71_vm0, %v24_v33 }
  0x1b   :  { %1832 = vmatmul.msk.f32.gmra.mxu0 %vm71_vm0, %v24_v33  ;;  %1848 = vmatmul.msk.f32.gmra.mxu1 %vm71_vm0, %v24_v33 }
  0x21   :  { %1865 = vmatmul.msk.f32.gmra.mxu2 %vm71_vm0, %v25_v34  ;;  %1881 = vmatmul.msk.f32.gmra.mxu3 %vm71_vm0, %v25_v34 }
  0x23   :  { %1833 = vmatmul.msk.f32.gmra.mxu0 %vm71_vm0, %v25_v34  ;;  %1849 = vmatmul.msk.f32.gmra.mxu1 %vm71_vm0, %v25_v34 }
  0x29   :  { %1866 = vmatmul.msk.f32.gmra.mxu2 %vm71_vm0, %v26_v35  ;;  %1882 = vmatmul.msk.f32.gmra.mxu3 %vm71_vm0, %v26_v35 }
  0x2b   :  { %1834 = vmatmul.msk.f32.gmra.mxu0 %vm71_vm0, %v26_v35  ;;  %1850 = vmatmul.msk.f32.gmra.mxu1 %vm71_vm0, %v26_v35 }
  0x31   :  { %1867 = vmatmul.msk.f32.gmra.mxu2 %vm71_vm0, %v27_v36  ;;  %1883 = vmatmul.msk.f32.gmra.mxu3 %vm71_vm0, %v27_v36 }
  0x33   :  { %1835 = vmatmul.msk.f32.gmra.mxu0 %vm71_vm0, %v27_v36  ;;  %1851 = vmatmul.msk.f32.gmra.mxu1 %vm71_vm0, %v27_v36 }
  0x39   :  { %1868 = vmatmul.msk.f32.gmra.mxu2 %vm71_vm0, %v28_v37  ;;  %1884 = vmatmul.msk.f32.gmra.mxu3 %vm71_vm0, %v28_v37 }
  0x3b   :  { %1836 = vmatmul.msk.f32.gmra.mxu0 %vm71_vm0, %v28_v37  ;;  %1852 = vmatmul.msk.f32.gmra.mxu1 %vm71_vm0, %v28_v37 }
  0x41   :  { %1869 = vmatmul.msk.f32.gmra.mxu2 %vm71_vm0, %v29_v38  ;;  %1885 = vmatmul.msk.f32.gmra.mxu3 %vm71_vm0, %v29_v38 }
  0x43   :  { %1837 = vmatmul.msk.f32.gmra.mxu0 %vm71_vm0, %v29_v38  ;;  %1853 = vmatmul.msk.f32.gmra.mxu1 %vm71_vm0, %v29_v38 }
  0x49   :  { %1870 = vmatmul.msk.f32.gmra.mxu2 %vm71_vm0, %v30_v39  ;;  %1886 = vmatmul.msk.f32.gmra.mxu3 %vm71_vm0, %v30_v39 }
  0x4b   :  { %1838 = vmatmul.msk.f32.gmra.mxu0 %vm71_vm0, %v30_v39  ;;  %1854 = vmatmul.msk.f32.gmra.mxu1 %vm71_vm0, %v30_v39 }
  0x51   :  { %1871 = vmatmul.msk.f32.gmra.mxu2 %vm71_vm0, %v31_v40  ;;  %1887 = vmatmul.msk.f32.gmra.mxu3 %vm71_vm0, %v31_v40 }
  0x53   :  { %1839 = vmatmul.msk.f32.gmra.mxu0 %vm71_vm0, %v31_v40  ;;  %1855 = vmatmul.msk.f32.gmra.mxu1 %vm71_vm0, %v31_v40 }
  0x59   :  { %1872 = vmatmul.msk.f32.gmra.mxu2 %vm71_vm0, %v32_v41  ;;  %1888 = vmatmul.msk.f32.gmra.mxu3 %vm71_vm0, %v32_v41 }
  0x5b   :  { %1840 = vmatmul.msk.f32.gmra.mxu0 %vm71_vm0, %v32_v41  ;;  %1856 = vmatmul.msk.f32.gmra.mxu1 %vm71_vm0, %v32_v41 }
  0x61   :  { %1873 = vmatmul.msk.f32.gmra.mxu2 %vm71_vm0, %v33_v42  ;;  %1889 = vmatmul.msk.f32.gmra.mxu3 %vm71_vm0, %v33_v42 }
  0x63   :  { %1841 = vmatmul.msk.f32.gmra.mxu0 %vm71_vm0, %v33_v42  ;;  %1857 = vmatmul.msk.f32.gmra.mxu1 %vm71_vm0, %v33_v42 }
  0x69   :  { %1874 = vmatmul.msk.f32.gmra.mxu2 %vm71_vm0, %v34_v46  ;;  %1890 = vmatmul.msk.f32.gmra.mxu3 %vm71_vm0, %v34_v46 }
  0x6b   :  { %1842 = vmatmul.msk.f32.gmra.mxu0 %vm71_vm0, %v34_v46  ;;  %1858 = vmatmul.msk.f32.gmra.mxu1 %vm71_vm0, %v34_v46 }
  0x71   :  { %1875 = vmatmul.msk.f32.gmra.mxu2 %vm71_vm0, %v35_v58  ;;  %1891 = vmatmul.msk.f32.gmra.mxu3 %vm71_vm0, %v35_v58 }
  0x73   :  { %1843 = vmatmul.msk.f32.gmra.mxu0 %vm71_vm0, %v35_v58  ;;  %1859 = vmatmul.msk.f32.gmra.mxu1 %vm71_vm0, %v35_v58 }
  0x79   :  { %1876 = vmatmul.msk.f32.gmra.mxu2 %vm71_vm0, %v36_v6  ;;  %1892 = vmatmul.msk.f32.gmra.mxu3 %vm71_vm0, %v36_v6 }
  0x7b   :  { %1844 = vmatmul.msk.f32.gmra.mxu0 %vm71_vm0, %v36_v6  ;;  %1860 = vmatmul.msk.f32.gmra.mxu1 %vm71_vm0, %v36_v6 }
  0x81   :  { %1877 = vmatmul.msk.f32.gmra.mxu2 %vm71_vm0, %v37_v18  ;;  %1893 = vmatmul.msk.f32.gmra.mxu3 %vm71_vm0, %v37_v18 }
  0x83   :  { %1845 = vmatmul.msk.f32.gmra.mxu0 %vm71_vm0, %v37_v18  ;;  %1861 = vmatmul.msk.f32.gmra.mxu1 %vm71_vm0, %v37_v18 }
  0x89   :  { %1878 = vmatmul.msk.f32.gmra.mxu2 %vm71_vm0, %v38_v30  ;;  %1894 = vmatmul.msk.f32.gmra.mxu3 %vm71_vm0, %v38_v30 }
  0x8b   :  { %1846 = vmatmul.msk.f32.gmra.mxu0 %vm71_vm0, %v38_v30  ;;  %1862 = vmatmul.msk.f32.gmra.mxu1 %vm71_vm0, %v38_v30 }
  0x90   :  { %v137_v47 = vpop.f32.mrf.mxu0  ;;  %v202_v48 = vpop.f32.mrf.mxu1 }
  0x91   :  { %v2331_v49 = vsub.f32 %v2319_v44, %v137_v47  ;;  %v2334_v50 = vsub.f32 %v2321_v45, %v202_v48 }
  0x93   :  { %v459_v53 = vmin.f32 %v2331_v49, %v2334_v50 }
  0x94   :  { %v267_v54 = vpop.f32.mrf.mxu2  ;;  %v332_v55 = vpop.f32.mrf.mxu3 }
  0x95   :  { %v2343_v56 = vsub.f32 %v2336_v51, %v267_v54  ;;  %v2346_v57 = vsub.f32 %v2338_v52, %v332_v55 }
  0x97   :  { %v460_v59 = vmin.f32 %v459_v53, %v2343_v56 }
  0x98   :  { %v140_v60 = vpop.f32.mrf.mxu0  ;;  %v205_v61 = vpop.f32.mrf.mxu1 }
  0x99   :  { %v2357_v62 = vsub.f32 %v2319_v44, %v140_v60  ;;  %v2360_v63 = vsub.f32 %v2321_v45, %v205_v61  ;;  %v461_v0 = vmin.f32 %v460_v59, %v2346_v57 }
  0x9b   :  { %v464_v1 = vmin.f32 %v2357_v62, %v2360_v63  ;;  %462 = vmin.xlane.f32.xlu0 %v461_v0 }
  0x9c   :  { %v270_v2 = vpop.f32.mrf.mxu2  ;;  %v335_v3 = vpop.f32.mrf.mxu3 }
  0x9d   :  { %v2366_v4 = vsub.f32 %v2336_v51, %v270_v2  ;;  %v2369_v5 = vsub.f32 %v2338_v52, %v335_v3 }
  0x9f   :  { %v465_v7 = vmin.f32 %v464_v1, %v2366_v4 }
  0xa0   :  { %v143_v8 = vpop.f32.mrf.mxu0  ;;  %v208_v9 = vpop.f32.mrf.mxu1 }
  0xa1   :  { %v2380_v10 = vsub.f32 %v2319_v44, %v143_v8  ;;  %v2383_v11 = vsub.f32 %v2321_v45, %v208_v9  ;;  %v466_v12 = vmin.f32 %v465_v7, %v2369_v5 }
  0xa3   :  { %v469_v13 = vmin.f32 %v2380_v10, %v2383_v11  ;;  %467 = vmin.xlane.f32.xlu0 %v466_v12 }
  0xa4   :  { %v273_v14 = vpop.f32.mrf.mxu2  ;;  %v338_v15 = vpop.f32.mrf.mxu3 }
  0xa5   :  { %v2389_v16 = vsub.f32 %v2336_v51, %v273_v14  ;;  %v2392_v17 = vsub.f32 %v2338_v52, %v338_v15 }
  0xa7   :  { %v470_v19 = vmin.f32 %v469_v13, %v2389_v16 }
  0xa8   :  { %v146_v20 = vpop.f32.mrf.mxu0  ;;  %v211_v21 = vpop.f32.mrf.mxu1 }
  0xa9   :  { %v2403_v22 = vsub.f32 %v2319_v44, %v146_v20  ;;  %v2406_v23 = vsub.f32 %v2321_v45, %v211_v21  ;;  %v471_v24 = vmin.f32 %v470_v19, %v2392_v17 }
  0xab   :  { %v474_v25 = vmin.f32 %v2403_v22, %v2406_v23  ;;  %472 = vmin.xlane.f32.xlu1 %v471_v24 }
  0xac   :  { %v276_v26 = vpop.f32.mrf.mxu2  ;;  %v341_v27 = vpop.f32.mrf.mxu3 }
  0xad   :  { %v2412_v28 = vsub.f32 %v2336_v51, %v276_v26  ;;  %v2415_v29 = vsub.f32 %v2338_v52, %v341_v27 }
  0xaf   :  { %v475_v31 = vmin.f32 %v474_v25, %v2412_v28 }
  0xb0   :  { %v149_v32 = vpop.f32.mrf.mxu0  ;;  %v214_v33 = vpop.f32.mrf.mxu1 }
  0xb1   :  { %v2426_v34 = vsub.f32 %v2319_v44, %v149_v32  ;;  %v2429_v35 = vsub.f32 %v2321_v45, %v214_v33  ;;  %v476_v36 = vmin.f32 %v475_v31, %v2415_v29 }
  0xb3   :  { %v479_v37 = vmin.f32 %v2426_v34, %v2429_v35  ;;  %477 = vmin.xlane.f32.xlu1 %v476_v36 }
  0xb4   :  { %v279_v38 = vpop.f32.mrf.mxu2  ;;  %v344_v39 = vpop.f32.mrf.mxu3 }
  0xb5   :  { %v2435_v40 = vsub.f32 %v2336_v51, %v279_v38  ;;  %v2438_v41 = vsub.f32 %v2338_v52, %v344_v39 }
  0xb7   :  { %v480_v42 = vmin.f32 %v479_v37, %v2435_v40  ;;  %v3501_v37 = vlaneseq }
  0xb8   :  { %v152_v43 = vpop.f32.mrf.mxu0  ;;  %v217_v46 = vpop.f32.mrf.mxu1 }
  0xb9   :  { %v2442_v47 = vsub.f32 %v2319_v44, %v152_v43  ;;  %v2445_v48 = vsub.f32 %v2321_v45, %v217_v46  ;;  %v481_v53 = vmin.f32 %v480_v42, %v2438_v41  ;;  %v2491_v39 = vand.u32 127, %v3501_v37 }
  0xbb   :  { %v484_v54 = vmin.f32 %v2442_v47, %v2445_v48  ;;  %482 = vmin.xlane.f32.xlu2 %v481_v53  ;;  %v2494_v43 = vadd.s32 128, %v2491_v39 }
  0xbc   :  { %v282_v55 = vpop.f32.mrf.mxu2  ;;  %v347_v58 = vpop.f32.mrf.mxu3 }
  0xbd   :  { %v2451_v59 = vsub.f32 %v2336_v51, %v282_v55  ;;  %v2454_v60 = vsub.f32 %v2338_v52, %v347_v58 }
  0xbf   :  { %v485_v61 = vmin.f32 %v484_v54, %v2451_v59  ;;  %v2497_v54 = vadd.s32 256, %v2491_v39 }
  0xc0   :  { %v155_v0 = vpop.f32.mrf.mxu0  ;;  %v220_v1 = vpop.f32.mrf.mxu1 }
  0xc1   :  { %v2458_v2 = vsub.f32 %v2319_v44, %v155_v0  ;;  %v2461_v3 = vsub.f32 %v2321_v45, %v220_v1  ;;  %v486_v6 = vmin.f32 %v485_v61, %v2454_v60  ;;  %v2505_v0 = vadd.s32 384, %v2491_v39 }
  0xc3   :  { %v489_v7 = vmin.f32 %v2458_v2, %v2461_v3  ;;  %487 = vmin.xlane.f32.xlu2 %v486_v6 }
  0xc4   :  { %v285_v8 = vpop.f32.mrf.mxu2  ;;  %v350_v9 = vpop.f32.mrf.mxu3 }
  0xc5   :  { %v2467_v12 = vsub.f32 %v2336_v51, %v285_v8  ;;  %v2470_v13 = vsub.f32 %v2338_v52, %v350_v9 }
  0xc7   :  { %v490_v14 = vmin.f32 %v489_v7, %v2467_v12 }
  0xc8   :  { %v158_v15 = vpop.f32.mrf.mxu0  ;;  %v223_v18 = vpop.f32.mrf.mxu1 }
  0xc9   :  { %v2474_v19 = vsub.f32 %v2319_v44, %v158_v15  ;;  %v2477_v20 = vsub.f32 %v2321_v45, %v223_v18  ;;  %v491_v21 = vmin.f32 %v490_v14, %v2470_v13 }
  0xcb   :  { %v494_v24 = vmin.f32 %v2474_v19, %v2477_v20  ;;  %492 = vmin.xlane.f32.xlu0 %v491_v21 }
  0xcc   :  { %v288_v25 = vpop.f32.mrf.mxu2  ;;  %v353_v26 = vpop.f32.mrf.mxu3 }
  0xcd   :  { %v2483_v27 = vsub.f32 %v2336_v51, %v288_v25  ;;  %v2486_v30 = vsub.f32 %v2338_v52, %v353_v26 }
  0xcf   :  { %v495_v31 = vmin.f32 %v494_v24, %v2483_v27 }
  0xd0   :  { %v161_v33 = vpop.f32.mrf.mxu0  ;;  %v226_v36 = vpop.f32.mrf.mxu1 }
  0xd1   :  { %v496_v32 = vmin.f32 %v495_v31, %v2486_v30  ;;  %v2510_v7 = vsub.f32 %v2319_v44, %v161_v33 }
  0xd3   :  { %497 = vmin.xlane.f32.xlu2 %v496_v32 }
  0xd4   :  { %v291_v38 = vpop.f32.mrf.mxu2  ;;  %v356_v42 = vpop.f32.mrf.mxu3 }
  0xd5   :  { %v2521_v18 = vsub.f32 %v2336_v51, %v291_v38  ;;  %v2531_v32 = vsub.f32 %v2338_v52, %v356_v42 }
  0xd8   :  { %v164_v46 = vpop.f32.mrf.mxu0  ;;  %v229_v53 = vpop.f32.mrf.mxu1 }
  0xd9   :  { %v2541_v38 = vsub.f32 %v2321_v45, %v229_v53 }
  0xdc   :  { %v294_v1 = vpop.f32.mrf.mxu2  ;;  %v359_v9 = vpop.f32.mrf.mxu3 }
  0xe0   :  { %v167_v21 = vpop.f32.mrf.mxu0  ;;  %v232_v24 = vpop.f32.mrf.mxu1 }
  0xe4   :  { %v362_v53 = vpop.f32.mrf.mxu3 }
 0x10e   :  { %v463_v55 = vpop.xlane.xlu0 %462 }
 0x10f   :  { %vm539_vm1 = vcmp.eq.f32.partialorder %v2331_v49, %v463_v55  ;;  %vm540_vm2 = vcmp.eq.f32.partialorder %v2334_v50, %v463_v55  ;;  %vm541_vm3 = vcmp.eq.f32.partialorder %v2343_v56, %v463_v55  ;;  %vm542_vm4 = vcmp.eq.f32.partialorder %v2346_v57, %v463_v55  ;;  %v297_v55 = vpop.f32.mrf.mxu2 }
 0x110   :  { %v603_v58 = vsel %vm539_vm1, %v2491_v39, 512  ;;  %v604_v61 = vsel %vm540_vm2, %v2494_v43, 512  ;;  %v605_v6 = vsel %vm541_vm3, %v2497_v54, 512  ;;  %v2513_v49 = vsub.f32 %v2321_v45, %v226_v36 }
 0x111   :  { %vm667_vm5 = vcmp.lt.s32.totalorder %v603_v58, %v604_v61  ;;  %v606_v56 = vsel %vm542_vm4, %v2505_v0, 512  ;;  %v2538_v36 = vsub.f32 %v2319_v44, %v164_v46 }
 0x112   :  { %v668_v50 = vsel %vm667_vm5, %v603_v58, %v604_v61  ;;  %v499_v57 = vmin.f32 %v2510_v7, %v2513_v49 }
 0x113   :  { %vm669_vm6 = vcmp.lt.s32.totalorder %v668_v50, %v605_v6  ;;  %v504_v46 = vmin.f32 %v2538_v36, %v2541_v38 }
 0x114   :  { %v670_v8 = vsel %vm669_vm6, %v668_v50, %v605_v6 }
 0x115   :  { %vm671_vm7 = vcmp.lt.s32.totalorder %v670_v8, %v606_v56 }
 0x116   :  { %v468_v14 = vpop.xlane.xlu0 %467  ;;  %v2518_v15 = vsel %vm671_vm7, %v670_v8, %v606_v56 }
 0x117   :  { %vm543_vm8 = vcmp.eq.f32.partialorder %v2357_v62, %v468_v14  ;;  %vm544_vm9 = vcmp.eq.f32.partialorder %v2360_v63, %v468_v14  ;;  %vm545_vm10 = vcmp.eq.f32.partialorder %v2366_v4, %v468_v14  ;;  %v674_v31 = vshra.s32 %v2518_v15, 16 }
 0x118   :  { %v607_v25 = vsel %vm543_vm8, %v2491_v39, 512  ;;  %v608_v26 = vsel %vm544_vm9, %v2494_v43, 512  ;;  %vm546_vm11 = vcmp.eq.f32.partialorder %v2369_v5, %v468_v14  ;;  %v609_v33 = vsel %vm545_vm10, %v2497_v54, 512 }
 0x119   :  { %vm687_vm12 = vcmp.lt.s32.totalorder %v607_v25, %v608_v26  ;;  %v2534_v62 = vcvt.s32.f32 %v674_v31  ;;  %v500_v63 = vmin.f32 %v499_v57, %v2521_v18  ;;  %v610_v5 = vsel %vm546_vm11, %v2505_v0, 512  ;;  %v170_v57 = vpop.f32.mrf.mxu0 }
 0x11a   :  { %v688_v4 = vsel %vm687_vm12, %v607_v25, %v608_v26  ;;  %v2557_v14 = vsub.f32 %v2336_v51, %v294_v1  ;;  %v2567_v26 = vsub.f32 %v2321_v45, %v232_v24 }
 0x11b   :  { %vm689_vm13 = vcmp.lt.s32.totalorder %v688_v4, %v609_v33  ;;  %677 = vmin.xlane.f32.xlu1 %v2534_v62  ;;  %v501_v6 = vmin.f32 %v500_v63, %v2531_v32  ;;  %v300_v63 = vpop.f32.mrf.mxu2 }
 0x11c   :  { %v690_v42 = vsel %vm689_vm13, %v688_v4, %v609_v33  ;;  %v505_v1 = vmin.f32 %v504_v46, %v2557_v14 }
 0x11d   :  { %vm691_vm14 = vcmp.lt.s32.totalorder %v690_v42, %v610_v5 }
 0x11e   :  { %v473_v58 = vpop.xlane.xlu1 %472  ;;  %v2545_v61 = vsel %vm691_vm14, %v690_v42, %v610_v5  ;;  %v2580_v42 = vsub.f32 %v2336_v51, %v297_v55  ;;  %v2591_v55 = vsub.f32 %v2338_v52, %v362_v53 }
 0x11f   :  { %vm547_vm15 = vcmp.eq.f32.partialorder %v2380_v10, %v473_v58  ;;  %vm548_vm1 = vcmp.eq.f32.partialorder %v2383_v11, %v473_v58  ;;  %vm549_vm2 = vcmp.eq.f32.partialorder %v2389_v16, %v473_v58  ;;  %v694_v8 = vshra.s32 %v2545_v61, 16  ;;  %v235_v11 = vpop.f32.mrf.mxu1 }
 0x120   :  { %v611_v50 = vsel %vm547_vm15, %v2491_v39, 512  ;;  %v612_v56 = vsel %vm548_vm1, %v2494_v43, 512  ;;  %vm550_vm3 = vcmp.eq.f32.partialorder %v2392_v17, %v473_v58  ;;  %v2561_v10 = vsub.f32 %v2319_v44, %v167_v21 }
 0x121   :  { %vm707_vm4 = vcmp.lt.s32.totalorder %v611_v50, %v612_v56  ;;  %v613_v16 = vsel %vm549_vm2, %v2497_v54, 512  ;;  %v2564_v25 = vcvt.s32.f32 %v694_v8  ;;  %v2572_v17 = vsub.f32 %v2338_v52, %v359_v9  ;;  %v173_v8 = vpop.f32.mrf.mxu0 }
 0x122   :  { %v708_v31 = vsel %vm707_vm4, %v611_v50, %v612_v56  ;;  %v614_v21 = vsel %vm550_vm3, %v2505_v0, 512  ;;  %v509_v24 = vmin.f32 %v2561_v10, %v2567_v26  ;;  %v365_v50 = vpop.f32.mrf.mxu3 }
 0x123   :  { %vm709_vm5 = vcmp.lt.s32.totalorder %v708_v31, %v613_v16  ;;  %697 = vmin.xlane.f32.xlu0 %v2564_v25  ;;  %502 = vmin.xlane.f32.xlu1 %v501_v6  ;;  %v506_v46 = vmin.f32 %v505_v1, %v2572_v17 }
 0x124   :  { %v710_v33 = vsel %vm709_vm5, %v708_v31, %v613_v16  ;;  %v2598_v16 = vsub.f32 %v2319_v44, %v170_v57  ;;  %v2601_v31 = vsub.f32 %v2321_v45, %v235_v11  ;;  %v303_v11 = vpop.f32.mrf.mxu2 }
 0x125   :  { %vm711_vm6 = vcmp.lt.s32.totalorder %v710_v33, %v614_v21 }
 0x126   :  { %v478_v4 = vpop.xlane.xlu1 %477  ;;  %v2577_v5 = vsel %vm711_vm6, %v710_v33, %v614_v21  ;;  %v514_v57 = vmin.f32 %v2598_v16, %v2601_v31 }
 0x127   :  { %vm551_vm7 = vcmp.eq.f32.partialorder %v2403_v22, %v478_v4  ;;  %vm552_vm8 = vcmp.eq.f32.partialorder %v2406_v23, %v478_v4  ;;  %vm553_vm9 = vcmp.eq.f32.partialorder %v2412_v28, %v478_v4  ;;  %v714_v6 = vshra.s32 %v2577_v5, 16 }
 0x128   :  { %v615_v9 = vsel %vm551_vm7, %v2491_v39, 512  ;;  %v616_v58 = vsel %vm552_vm8, %v2494_v43, 512  ;;  %vm554_vm10 = vcmp.eq.f32.partialorder %v2415_v29, %v478_v4  ;;  %v617_v22 = vsel %vm553_vm9, %v2497_v54, 512  ;;  %v238_v29 = vpop.f32.mrf.mxu1 }
 0x129   :  { %vm727_vm11 = vcmp.lt.s32.totalorder %v615_v9, %v616_v58  ;;  %v2594_v23 = vcvt.s32.f32 %v714_v6  ;;  %v510_v28 = vmin.f32 %v509_v24, %v2580_v42  ;;  %v618_v53 = vsel %vm554_vm10, %v2505_v0, 512 }
 0x12a   :  { %v728_v56 = vsel %vm727_vm11, %v615_v9, %v616_v58  ;;  %v2617_v6 = vsub.f32 %v2336_v51, %v300_v63 }
 0x12b   :  { %vm729_vm12 = vcmp.lt.s32.totalorder %v728_v56, %v617_v22  ;;  %717 = vmin.xlane.f32.xlu2 %v2594_v23  ;;  %507 = vmin.xlane.f32.xlu0 %v506_v46  ;;  %v511_v4 = vmin.f32 %v510_v28, %v2591_v55  ;;  %v2627_v46 = vsub.f32 %v2321_v45, %v238_v29  ;;  %v368_v28 = vpop.f32.mrf.mxu3 }
 0x12c   :  { %v730_v1 = vsel %vm729_vm12, %v728_v56, %v617_v22  ;;  %v515_v63 = vmin.f32 %v514_v57, %v2617_v6 }
 0x12d   :  { %vm731_vm13 = vcmp.lt.s32.totalorder %v730_v1, %v618_v53 }
 0x12e   :  { %v483_v21 = vpop.xlane.xlu2 %482  ;;  %v2605_v33 = vsel %vm731_vm13, %v730_v1, %v618_v53  ;;  %v176_v53 = vpop.f32.mrf.mxu0 }
 0x12f   :  { %vm555_vm14 = vcmp.eq.f32.partialorder %v2426_v34, %v483_v21  ;;  %vm556_vm15 = vcmp.eq.f32.partialorder %v2429_v35, %v483_v21  ;;  %vm557_vm1 = vcmp.eq.f32.partialorder %v2435_v40, %v483_v21  ;;  %v734_v58 = vshra.s32 %v2605_v33, 16 }
 0x130   :  { %v619_v24 = vsel %vm555_vm14, %v2491_v39, 512  ;;  %v620_v9 = vsel %vm556_vm15, %v2494_v43, 512  ;;  %vm558_vm2 = vcmp.eq.f32.partialorder %v2438_v41, %v483_v21  ;;  %v2621_v34 = vsub.f32 %v2319_v44, %v173_v8  ;;  %v241_v1 = vpop.f32.mrf.mxu1 }
 0x131   :  { %vm747_vm3 = vcmp.lt.s32.totalorder %v619_v24, %v620_v9  ;;  %v621_v35 = vsel %vm557_vm1, %v2497_v54, 512  ;;  %v2624_v40 = vcvt.s32.f32 %v734_v58  ;;  %v2632_v41 = vsub.f32 %v2338_v52, %v365_v50 }
 0x132   :  { %v748_v22 = vsel %vm747_vm3, %v619_v24, %v620_v9  ;;  %v622_v56 = vsel %vm558_vm2, %v2505_v0, 512  ;;  %v519_v29 = vmin.f32 %v2621_v34, %v2627_v46  ;;  %v2640_v9 = vsub.f32 %v2336_v51, %v303_v11 }
 0x133   :  { %vm749_vm4 = vcmp.lt.s32.totalorder %v748_v22, %v621_v35  ;;  %737 = vmin.xlane.f32.xlu1 %v2624_v40  ;;  %512 = vmin.xlane.f32.xlu2 %v511_v4  ;;  %v516_v58 = vmin.f32 %v515_v63, %v2632_v41  ;;  %v2651_v11 = vsub.f32 %v2338_v52, %v368_v28  ;;  %v371_v63 = vpop.f32.mrf.mxu3 }
 0x134   :  { %v750_v8 = vsel %vm749_vm4, %v748_v22, %v621_v35  ;;  %v306_v35 = vpop.f32.mrf.mxu2 }
 0x135   :  { %vm751_vm5 = vcmp.lt.s32.totalorder %v750_v8, %v622_v56 }
 0x136   :  { %v488_v21 = vpop.xlane.xlu2 %487  ;;  %v2637_v24 = vsel %vm751_vm5, %v750_v8, %v622_v56  ;;  %v2658_v56 = vsub.f32 %v2319_v44, %v176_v53  ;;  %v2661_v8 = vsub.f32 %v2321_v45, %v241_v1 }
 0x137   :  { %vm559_vm6 = vcmp.eq.f32.partialorder %v2442_v47, %v488_v21  ;;  %vm560_vm7 = vcmp.eq.f32.partialorder %v2445_v48, %v488_v21  ;;  %vm561_vm8 = vcmp.eq.f32.partialorder %v2451_v59, %v488_v21  ;;  %v754_v57 = vshra.s32 %v2637_v24, 16 }
 0x138   :  { %v623_v50 = vsel %vm559_vm6, %v2491_v39, 512  ;;  %v624_v4 = vsel %vm560_vm7, %v2494_v43, 512  ;;  %vm562_vm9 = vcmp.eq.f32.partialorder %v2454_v60, %v488_v21  ;;  %v625_v47 = vsel %vm561_vm8, %v2497_v54, 512  ;;  %v244_v1 = vpop.f32.mrf.mxu1 }
 0x139   :  { %vm767_vm10 = vcmp.lt.s32.totalorder %v623_v50, %v624_v4  ;;  %v2654_v48 = vcvt.s32.f32 %v754_v57  ;;  %v520_v59 = vmin.f32 %v519_v29, %v2640_v9  ;;  %v626_v60 = vsel %vm562_vm9, %v2505_v0, 512 }
 0x13a   :  { %v768_v22 = vsel %vm767_vm10, %v623_v50, %v624_v4  ;;  %v179_v50 = vpop.f32.mrf.mxu0  ;;  %v524_v53 = vmin.f32 %v2658_v56, %v2661_v8 }
 0x13b   :  { %vm769_vm11 = vcmp.lt.s32.totalorder %v768_v22, %v625_v47  ;;  %757 = vmin.xlane.f32.xlu0 %v2654_v48  ;;  %517 = vmin.xlane.f32.xlu1 %v516_v58  ;;  %v521_v29 = vmin.f32 %v520_v59, %v2651_v11  ;;  %v2687_v59 = vsub.f32 %v2321_v45, %v244_v1 }
 0x13c   :  { %v770_v28 = vsel %vm769_vm11, %v768_v22, %v625_v47  ;;  %v2677_v22 = vsub.f32 %v2336_v51, %v306_v35 }
 0x13d   :  { %vm771_vm12 = vcmp.lt.s32.totalorder %v770_v28, %v626_v60 }
 0x13e   :  { %v493_v21 = vpop.xlane.xlu0 %492  ;;  %v2665_v57 = vsel %vm771_vm12, %v770_v28, %v626_v60  ;;  %v309_v28 = vpop.f32.mrf.mxu2  ;;  %v525_v35 = vmin.f32 %v524_v53, %v2677_v22 }
 0x13f   :  { %vm563_vm13 = vcmp.eq.f32.partialorder %v2458_v2, %v493_v21  ;;  %vm564_vm14 = vcmp.eq.f32.partialorder %v2461_v3, %v493_v21  ;;  %vm565_vm15 = vcmp.eq.f32.partialorder %v2467_v12, %v493_v21  ;;  %v774_v47 = vshra.s32 %v2665_v57, 16 }
 0x140   :  { %v627_v4 = vsel %vm563_vm13, %v2491_v39, 512  ;;  %v628_v58 = vsel %vm564_vm14, %v2494_v43, 512  ;;  %vm566_vm1 = vcmp.eq.f32.partialorder %v2470_v13, %v493_v21  ;;  %v2681_v2 = vsub.f32 %v2319_v44, %v179_v50 }
 0x141   :  { %vm787_vm2 = vcmp.lt.s32.totalorder %v627_v4, %v628_v58  ;;  %v629_v3 = vsel %vm565_vm15, %v2497_v54, 512  ;;  %v2684_v12 = vcvt.s32.f32 %v774_v47  ;;  %v2692_v13 = vsub.f32 %v2338_v52, %v371_v63  ;;  %v374_v63 = vpop.f32.mrf.mxu3 }
 0x142   :  { %v788_v60 = vsel %vm787_vm2, %v627_v4, %v628_v58  ;;  %v630_v21 = vsel %vm566_vm1, %v2505_v0, 512  ;;  %v529_v1 = vmin.f32 %v2681_v2, %v2687_v59 }
 0x143   :  { %vm789_vm3 = vcmp.lt.s32.totalorder %v788_v60, %v629_v3  ;;  %777 = vmin.xlane.f32.xlu2 %v2684_v12  ;;  %522 = vmin.xlane.f32.xlu1 %v521_v29  ;;  %v2703_v29 = vsub.f32 %v2336_v51, %v309_v28 }
 0x144   :  { %v790_v50 = vsel %vm789_vm3, %v788_v60, %v629_v3  ;;  %v526_v3 = vmin.f32 %v525_v35, %v2692_v13  ;;  %v247_v60 = vpop.f32.mrf.mxu1 }
 0x145   :  { %vm791_vm4 = vcmp.lt.s32.totalorder %v790_v50, %v630_v21 }
 0x146   :  { %v498_v47 = vpop.xlane.xlu2 %497  ;;  %v2697_v37 = vsel %vm791_vm4, %v790_v50, %v630_v21  ;;  %v530_v21 = vmin.f32 %v529_v1, %v2703_v29  ;;  %v2715_v50 = vsub.f32 %v2338_v52, %v374_v63 }
 0x147   :  { %vm567_vm5 = vcmp.eq.f32.partialorder %v2474_v19, %v498_v47  ;;  %vm568_vm6 = vcmp.eq.f32.partialorder %v2477_v20, %v498_v47  ;;  %vm569_vm7 = vcmp.eq.f32.partialorder %v2483_v27, %v498_v47  ;;  %v794_v58 = vshra.s32 %v2697_v37, 16  ;;  %v182_v19 = vpop.f32.mrf.mxu0 }
 0x148   :  { %v631_v53 = vsel %vm567_vm5, %v2491_v39, 512  ;;  %v632_v4 = vsel %vm568_vm6, %v2494_v43, 512  ;;  %vm570_vm8 = vcmp.eq.f32.partialorder %v2486_v30, %v498_v47  ;;  %v633_v20 = vsel %vm569_vm7, %v2497_v54, 512 }
 0x149   :  { %vm807_vm9 = vcmp.lt.s32.totalorder %v631_v53, %v632_v4  ;;  %v2711_v27 = vcvt.s32.f32 %v794_v58  ;;  %v2719_v35 = vsub.f32 %v2319_v44, %v182_v19  ;;  %v2722_v30 = vsub.f32 %v2321_v45, %v247_v60  ;;  %v377_v45 = vpop.f32.mrf.mxu3 }
 0x14a   :  { %v808_v28 = vsel %vm807_vm9, %v631_v53, %v632_v4  ;;  %v634_v47 = vsel %vm570_vm8, %v2505_v0, 512  ;;  %v312_v53 = vpop.f32.mrf.mxu2 }
 0x14b   :  { %vm809_vm10 = vcmp.lt.s32.totalorder %v808_v28, %v633_v20  ;;  %797 = vmin.xlane.f32.xlu2 %v2711_v27  ;;  %527 = vmin.xlane.f32.xlu1 %v526_v3  ;;  %v534_v63 = vmin.f32 %v2719_v35, %v2722_v30  ;;  %v531_v3 = vmin.f32 %v530_v21, %v2715_v50 }
 0x14c   :  { %v810_v58 = vsel %vm809_vm10, %v808_v28, %v633_v20  ;;  %v2732_v44 = vsub.f32 %v2336_v51, %v312_v53  ;;  %v2739_v20 = vsub.f32 %v2338_v52, %v377_v45  ;;  %v693_v53 = vand.u32 65535, %v2545_v61 }
 0x14d   :  { %vm811_vm11 = vcmp.lt.s32.totalorder %v810_v58, %v634_v47 }
 0x14e   :  { %v2725_v4 = vsel %vm811_vm11, %v810_v58, %v634_v47  ;;  %v535_v60 = vmin.f32 %v534_v63, %v2732_v44  ;;  %v673_v47 = vand.u32 65535, %v2518_v15 }
 0x14f   :  { %v814_v1 = vshra.s32 %v2725_v4, 16 }
 0x150   :  { %v536_v28 = vmin.f32 %v535_v60, %v2739_v20  ;;  %v675_v51 = vcvt.s32.f32 %v673_v47 }
 0x151   :  { %v2734_v19 = vcvt.s32.f32 %v814_v1 }
 0x153   :  { %817 = vmin.xlane.f32.xlu2 %v2734_v19  ;;  %532 = vmin.xlane.f32.xlu1 %v531_v3  ;;  %v695_v3 = vcvt.s32.f32 %v693_v53 }
 0x15b   :  { %537 = vmin.xlane.f32.xlu1 %v536_v28 }
 0x18e   :  { %v2743_v21 = vpop.xlane.xlu1 %677 }
 0x18f   :  { %vm679_vm12 = vcmp.eq.f32.partialorder %v2534_v62, %v2743_v21 }
 0x190   :  { %v680_v58 = vsel %vm679_vm12, %v675_v51, inf }
 0x191   :  { %681 = vmin.xlane.f32.xlu0 %v680_v58 }
 0x196   :  { %v2748_v1 = vpop.xlane.xlu0 %697  ;;  %v503_v63 = vpop.xlane.xlu1 %502 }
 0x197   :  { %vm571_vm13 = vcmp.eq.f32.partialorder %v2510_v7, %v503_v63  ;;  %vm572_vm14 = vcmp.eq.f32.partialorder %v2513_v49, %v503_v63  ;;  %vm573_vm15 = vcmp.eq.f32.partialorder %v2521_v18, %v503_v63  ;;  %vm574_vm1 = vcmp.eq.f32.partialorder %v2531_v32, %v503_v63 }
 0x198   :  { %v635_v52 = vsel %vm571_vm13, %v2491_v39, 512  ;;  %v636_v15 = vsel %vm572_vm14, %v2494_v43, 512  ;;  %vm699_vm3 = vcmp.eq.f32.partialorder %v2564_v25, %v2748_v1  ;;  %v637_v62 = vsel %vm573_vm15, %v2497_v54, 512 }
 0x199   :  { %vm827_vm2 = vcmp.lt.s32.totalorder %v635_v52, %v636_v15  ;;  %v700_v61 = vsel %vm699_vm3, %v695_v3, inf  ;;  %v713_v7 = vand.u32 65535, %v2577_v5  ;;  %v638_v49 = vsel %vm574_vm1, %v2505_v0, 512 }
 0x19a   :  { %v828_v45 = vsel %vm827_vm2, %v635_v52, %v636_v15  ;;  %701 = vmin.xlane.f32.xlu0 %v700_v61 }
 0x19b   :  { %vm829_vm4 = vcmp.lt.s32.totalorder %v828_v45, %v637_v62  ;;  %v715_v5 = vcvt.s32.f32 %v713_v7 }
 0x19c   :  { %v830_v18 = vsel %vm829_vm4, %v828_v45, %v637_v62 }
 0x19d   :  { %vm831_vm5 = vcmp.lt.s32.totalorder %v830_v18, %v638_v49 }
 0x19e   :  { %v2761_v60 = vpop.xlane.xlu2 %717  ;;  %v508_v28 = vpop.xlane.xlu0 %507  ;;  %v2763_v32 = vsel %vm831_vm5, %v830_v18, %v638_v49 }
 0x19f   :  { %vm575_vm6 = vcmp.eq.f32.partialorder %v2538_v36, %v508_v28  ;;  %vm576_vm7 = vcmp.eq.f32.partialorder %v2541_v38, %v508_v28  ;;  %vm577_vm8 = vcmp.eq.f32.partialorder %v2557_v14, %v508_v28  ;;  %vm578_vm9 = vcmp.eq.f32.partialorder %v2572_v17, %v508_v28 }
 0x1a0   :  { %v639_v25 = vsel %vm575_vm6, %v2491_v39, 512  ;;  %v640_v47 = vsel %vm576_vm7, %v2494_v43, 512  ;;  %vm719_vm11 = vcmp.eq.f32.partialorder %v2594_v23, %v2761_v60  ;;  %v834_v51 = vshra.s32 %v2763_v32, 16 }
 0x1a1   :  { %vm847_vm10 = vcmp.lt.s32.totalorder %v639_v25, %v640_v47  ;;  %v641_v58 = vsel %vm577_vm8, %v2497_v54, 512  ;;  %v720_v36 = vsel %vm719_vm11, %v715_v5, inf  ;;  %v733_v14 = vand.u32 65535, %v2605_v33 }
 0x1a2   :  { %v848_v53 = vsel %vm847_vm10, %v639_v25, %v640_v47  ;;  %721 = vmin.xlane.f32.xlu0 %v720_v36  ;;  %v2775_v38 = vcvt.s32.f32 %v834_v51  ;;  %v642_v63 = vsel %vm578_vm9, %v2505_v0, 512 }
 0x1a3   :  { %vm849_vm12 = vcmp.lt.s32.totalorder %v848_v53, %v641_v58  ;;  %v735_v62 = vcvt.s32.f32 %v733_v14  ;;  %v1226_v14 = vld [vmem:[%s3494_s1 + $0x178] sm:$0xff] }
 0x1a4   :  { %v850_v52 = vsel %vm849_vm12, %v848_v53, %v641_v58  ;;  %837 = vmin.xlane.f32.xlu2 %v2775_v38  ;;  %1373 = vmatpush.msrb.mxu2 %v1226_v14 }
 0x1a5   :  { %vm851_vm13 = vcmp.lt.s32.totalorder %v850_v52, %v642_v63 }
 0x1a6   :  { %v2780_v17 = vpop.xlane.xlu1 %737  ;;  %v513_v23 = vpop.xlane.xlu2 %512  ;;  %v2782_v15 = vsel %vm851_vm13, %v850_v52, %v642_v63  ;;  %v1193_v63 = vld [vmem:[%s3494_s1 + $0x70] sm:$0xff] }
 0x1a7   :  { %vm579_vm14 = vcmp.eq.f32.partialorder %v2561_v10, %v513_v23  ;;  %vm580_vm15 = vcmp.eq.f32.partialorder %v2567_v26, %v513_v23  ;;  %vm581_vm1 = vcmp.eq.f32.partialorder %v2580_v42, %v513_v23  ;;  %vm582_vm2 = vcmp.eq.f32.partialorder %v2591_v55, %v513_v23  ;;  %v1209_v52 = vld [vmem:[%s3494_s1 + $0xf0] sm:$0xff] }
 0x1a8   :  { %v643_v3 = vsel %vm579_vm14, %v2491_v39, 512  ;;  %v644_v33 = vsel %vm580_vm15, %v2494_v43, 512  ;;  %vm739_vm4 = vcmp.eq.f32.partialorder %v2624_v40, %v2780_v17  ;;  %v854_v61 = vshra.s32 %v2782_v15, 16 }
 0x1a9   :  { %vm867_vm3 = vcmp.lt.s32.totalorder %v643_v3, %v644_v33  ;;  %v645_v45 = vsel %vm581_vm1, %v2497_v54, 512  ;;  %v740_v10 = vsel %vm739_vm4, %v735_v62, inf  ;;  %v753_v42 = vand.u32 65535, %v2637_v24  ;;  %v1225_v62 = vld [vmem:[%s3494_s1 + $0x170] sm:$0xff] }
 0x1aa   :  { %v868_v7 = vsel %vm867_vm3, %v643_v3, %v644_v33  ;;  %741 = vmin.xlane.f32.xlu0 %v740_v10  ;;  %v2794_v26 = vcvt.s32.f32 %v854_v61  ;;  %v646_v49 = vsel %vm582_vm2, %v2505_v0, 512  ;;  %v1241_v61 = vld [vmem:[%s3494_s1 + $0x1f0] sm:$0xff]  ;;  %v1208_v10 = vld [vmem:[%s3494_s1 + $0xe8] sm:$0xff]  ;;  %1374 = vmatpush.msrb.mxu2 %v1225_v62 }
 0x1ab   :  { %vm869_vm5 = vcmp.lt.s32.totalorder %v868_v7, %v645_v45  ;;  %v755_v47 = vcvt.s32.f32 %v753_v42  ;;  %v1188_v62 = vld [vmem:[%s3494_s1 + $0x48] sm:$0xff] }
 0x1ac   :  { %v870_v18 = vsel %vm869_vm5, %v868_v7, %v645_v45  ;;  %857 = vmin.xlane.f32.xlu2 %v2794_v26  ;;  %v1192_v45 = vld [vmem:[%s3494_s1 + $0x68] sm:$0xff] }
 0x1ad   :  { %vm871_vm6 = vcmp.lt.s32.totalorder %v870_v18, %v646_v49  ;;  %v1224_v7 = vld [vmem:[%s3494_s1 + $0x168] sm:$0xff] }
 0x1ae   :  { %v2799_v55 = vpop.xlane.xlu0 %757  ;;  %v518_v40 = vpop.xlane.xlu1 %517  ;;  %v2801_v28 = vsel %vm871_vm6, %v870_v18, %v646_v49  ;;  %1375 = vmatpush.msrb.mxu2 %v1224_v7  ;;  %v1220_v7 = vld [vmem:[%s3494_s1 + $0x148] sm:$0xff] }
 0x1af   :  { %vm583_vm7 = vcmp.eq.f32.partialorder %v2598_v16, %v518_v40  ;;  %vm584_vm8 = vcmp.eq.f32.partialorder %v2601_v31, %v518_v40  ;;  %vm585_vm9 = vcmp.eq.f32.partialorder %v2617_v6, %v518_v40  ;;  %vm586_vm10 = vcmp.eq.f32.partialorder %v2632_v41, %v518_v40  ;;  %v1194_v41 = vld [vmem:[%s3494_s1 + $0x78] sm:$0xff]  ;;  %v1191_v40 = vld [vmem:[%s3494_s1 + $0x60] sm:$0xff] }
 0x1b0   :  { %v647_v25 = vsel %vm583_vm7, %v2491_v39, 512  ;;  %v648_v24 = vsel %vm584_vm8, %v2494_v43, 512  ;;  %vm759_vm12 = vcmp.eq.f32.partialorder %v2654_v48, %v2799_v55  ;;  %v874_v5 = vshra.s32 %v2801_v28, 16  ;;  %v1210_v48 = vld [vmem:[%s3494_s1 + $0xf8] sm:$0xff]  ;;  %1243 = vmatpush.msrb.mxu0 %v1194_v41 }
 0x1b1   :  { %vm887_vm11 = vcmp.lt.s32.totalorder %v647_v25, %v648_v24  ;;  %v649_v51 = vsel %vm585_vm9, %v2497_v54, 512  ;;  %v760_v16 = vsel %vm759_vm12, %v755_v47, inf  ;;  %v773_v6 = vand.u32 65535, %v2665_v57  ;;  %v1242_v57 = vld [vmem:[%s3494_s1 + $0x1f8] sm:$0xff]  ;;  %1308 = vmatpush.msrb.mxu1 %v1210_v48 }
 0x1b2   :  { %v888_v58 = vsel %vm887_vm11, %v647_v25, %v648_v24  ;;  %761 = vmin.xlane.f32.xlu0 %v760_v16  ;;  %v2813_v31 = vcvt.s32.f32 %v874_v5  ;;  %v650_v36 = vsel %vm586_vm10, %v2505_v0, 512  ;;  %1438 = vmatpush.msrb.mxu3 %v1242_v57  ;;  %v1207_v25 = vld [vmem:[%s3494_s1 + $0xe0] sm:$0xff]  ;;  %v1222_v41 = vld [vmem:[%s3494_s1 + $0x158] sm:$0xff] }
 0x1b3   :  { %vm889_vm13 = vcmp.lt.s32.totalorder %v888_v58, %v649_v51  ;;  %1244 = vmatpush.msrb.mxu0 %v1193_v63  ;;  %v775_v18 = vcvt.s32.f32 %v773_v6  ;;  %1309 = vmatpush.msrb.mxu1 %v1209_v52  ;;  %v1239_v16 = vld [vmem:[%s3494_s1 + $0x1e0] sm:$0xff]  ;;  %v1205_v63 = vld [vmem:[%s3494_s1 + $0xd0] sm:$0xff] }
 0x1b4   :  { %v890_v53 = vsel %vm889_vm13, %v888_v58, %v649_v51  ;;  %877 = vmin.xlane.f32.xlu1 %v2813_v31  ;;  %1439 = vmatpush.msrb.mxu3 %v1241_v61  ;;  %v793_v58 = vand.u32 65535, %v2697_v37  ;;  %v1238_v37 = vld [vmem:[%s3494_s1 + $0x1d8] sm:$0xff]  ;;  %v1221_v52 = vld [vmem:[%s3494_s1 + $0x150] sm:$0xff] }
 0x1b5   :  { %vm891_vm14 = vcmp.lt.s32.totalorder %v890_v53, %v650_v36  ;;  %1245 = vmatpush.msrb.mxu0 %v1192_v45  ;;  %1310 = vmatpush.msrb.mxu1 %v1208_v10 }
 0x1b6   :  { %v2836_v23 = vpop.xlane.xlu2 %777  ;;  %v523_v3 = vpop.xlane.xlu1 %522  ;;  %v2838_v33 = vsel %vm891_vm14, %v890_v53, %v650_v36  ;;  %v1206_v53 = vld [vmem:[%s3494_s1 + $0xd8] sm:$0xff]  ;;  %v795_v10 = vcvt.s32.f32 %v793_v58 }
 0x1b7   :  { %vm587_vm15 = vcmp.eq.f32.partialorder %v2621_v34, %v523_v3  ;;  %vm588_vm1 = vcmp.eq.f32.partialorder %v2627_v46, %v523_v3  ;;  %vm589_vm2 = vcmp.eq.f32.partialorder %v2640_v9, %v523_v3  ;;  %v1240_v34 = vld [vmem:[%s3494_s1 + $0x1e8] sm:$0xff]  ;;  %vm590_vm3 = vcmp.eq.f32.partialorder %v2651_v11, %v523_v3  ;;  %v1190_v9 = vld [vmem:[%s3494_s1 + $0x58] sm:$0xff]  ;;  %1246 = vmatpush.msrb.mxu0 %v1191_v40  ;;  %v1189_v11 = vld [vmem:[%s3494_s1 + $0x50] sm:$0xff] }
 0x1b8   :  { %v651_v42 = vsel %vm587_vm15, %v2491_v39, 512  ;;  %v652_v49 = vsel %vm588_vm1, %v2494_v43, 512  ;;  %vm779_vm5 = vcmp.eq.f32.partialorder %v2684_v12, %v2836_v23  ;;  %v894_v46 = vshra.s32 %v2838_v33, 16  ;;  %v1223_v12 = vld [vmem:[%s3494_s1 + $0x160] sm:$0xff]  ;;  %1440 = vmatpush.msrb.mxu3 %v1240_v34  ;;  %1311 = vmatpush.msrb.mxu1 %v1207_v25  ;;  %v1237_v3 = vld [vmem:[%s3494_s1 + $0x1d0] sm:$0xff] }
 0x1b9   :  { %vm907_vm4 = vcmp.lt.s32.totalorder %v651_v42, %v652_v49  ;;  %v653_v24 = vsel %vm589_vm2, %v2497_v54, 512  ;;  %v780_v47 = vsel %vm779_vm5, %v775_v18, inf  ;;  %v654_v6 = vsel %vm590_vm3, %v2505_v0, 512  ;;  %1376 = vmatpush.msrb.mxu2 %v1223_v12  ;;  %1247 = vmatpush.msrb.mxu0 %v1190_v9  ;;  %v1203_v40 = vld [vmem:[%s3494_s1 + $0xc0] sm:$0xff]  ;;  %v1186_v12 = vld [vmem:[%s3494_s1 + $0x38] sm:$0xff] }
 0x1ba   :  { %v908_v5 = vsel %vm907_vm4, %v651_v42, %v652_v49  ;;  %781 = vmin.xlane.f32.xlu2 %v780_v47  ;;  %v2879_v51 = vcvt.s32.f32 %v894_v46  ;;  %1441 = vmatpush.msrb.mxu3 %v1239_v16  ;;  %v1236_v42 = vld [vmem:[%s3494_s1 + $0x1c8] sm:$0xff]  ;;  %v813_v25 = vand.u32 65535, %v2725_v4  ;;  %v1218_v4 = vld [vmem:[%s3494_s1 + $0x138] sm:$0xff] }
 0x1bb   :  { %vm909_vm6 = vcmp.lt.s32.totalorder %v908_v5, %v653_v24  ;;  %1312 = vmatpush.msrb.mxu1 %v1206_v53  ;;  %1377 = vmatpush.msrb.mxu2 %v1222_v41  ;;  %v1201_v53 = vld [vmem:[%s3494_s1 + $0xb0] sm:$0xff] }
 0x1bc   :  { %v910_v36 = vsel %vm909_vm6, %v908_v5, %v653_v24  ;;  %897 = vmin.xlane.f32.xlu0 %v2879_v51  ;;  %1442 = vmatpush.msrb.mxu3 %v1238_v37  ;;  %v1235_v5 = vld [vmem:[%s3494_s1 + $0x1c0] sm:$0xff]  ;;  %v1217_v41 = vld [vmem:[%s3494_s1 + $0x130] sm:$0xff] }
 0x1bd   :  { %vm911_vm7 = vcmp.lt.s32.totalorder %v910_v36, %v654_v6  ;;  %1248 = vmatpush.msrb.mxu0 %v1189_v11  ;;  %1313 = vmatpush.msrb.mxu1 %v1205_v63  ;;  %v1184_v63 = vld [vmem:[%s3494_s1 + $0x28] sm:$0xff] }
 0x1be   :  { %v2904_v48 = vpop.xlane.xlu2 %797  ;;  %v528_v14 = vpop.xlane.xlu1 %527  ;;  %v2906_v57 = vsel %vm911_vm7, %v910_v36, %v654_v6  ;;  %1378 = vmatpush.msrb.mxu2 %v1221_v52  ;;  %1443 = vmatpush.msrb.mxu3 %v1237_v3  ;;  %v1234_v6 = vld [vmem:[%s3494_s1 + $0x1b8] sm:$0xff]  ;;  %v1185_v36 = vld [vmem:[%s3494_s1 + $0x30] sm:$0xff]  ;;  %v1200_v52 = vld [vmem:[%s3494_s1 + $0xa8] sm:$0xff] }
 0x1bf   :  { %vm591_vm8 = vcmp.eq.f32.partialorder %v2658_v56, %v528_v14  ;;  %vm592_vm9 = vcmp.eq.f32.partialorder %v2661_v8, %v528_v14  ;;  %vm593_vm10 = vcmp.eq.f32.partialorder %v2677_v22, %v528_v14  ;;  %v1204_v56 = vld [vmem:[%s3494_s1 + $0xc8] sm:$0xff]  ;;  %vm594_vm11 = vcmp.eq.f32.partialorder %v2692_v13, %v528_v14  ;;  %1249 = vmatpush.msrb.mxu0 %v1188_v62  ;;  %v1219_v22 = vld [vmem:[%s3494_s1 + $0x140] sm:$0xff]  ;;  %v1202_v13 = vld [vmem:[%s3494_s1 + $0xb8] sm:$0xff] }
 0x1c0   :  { %v655_v61 = vsel %vm591_vm8, %v2491_v39, 512  ;;  %v656_v45 = vsel %vm592_vm9, %v2494_v43, 512  ;;  %vm799_vm13 = vcmp.eq.f32.partialorder %v2711_v27, %v2904_v48  ;;  %v914_v8 = vshra.s32 %v2906_v57, 16  ;;  %v1187_v27 = vld [vmem:[%s3494_s1 + $0x40] sm:$0xff]  ;;  %1314 = vmatpush.msrb.mxu1 %v1204_v56  ;;  %1379 = vmatpush.msrb.mxu2 %v1220_v7 }
 0x1c1   :  { %vm927_vm12 = vcmp.lt.s32.totalorder %v655_v61, %v656_v45  ;;  %v657_v49 = vsel %vm593_vm10, %v2497_v54, 512  ;;  %v800_v18 = vsel %vm799_vm13, %v795_v10, inf  ;;  %v658_v24 = vsel %vm594_vm11, %v2505_v0, 512  ;;  %1444 = vmatpush.msrb.mxu3 %v1236_v42  ;;  %1250 = vmatpush.msrb.mxu0 %v1187_v27  ;;  %v1232_v10 = vld [vmem:[%s3494_s1 + $0x1a8] sm:$0xff]  ;;  %v1199_v7 = vld [vmem:[%s3494_s1 + $0xa0] sm:$0xff]  ;;  %v1214_v27 = vld [vmem:[%s3494_s1 + $0x118] sm:$0xff] }
 0x1c2   :  { %v928_v34 = vsel %vm927_vm12, %v655_v61, %v656_v45  ;;  %801 = vmin.xlane.f32.xlu1 %v800_v18  ;;  %v2944_v46 = vcvt.s32.f32 %v914_v8  ;;  %1315 = vmatpush.msrb.mxu1 %v1203_v40  ;;  %v815_v14 = vcvt.s32.f32 %v813_v25  ;;  %v1215_v42 = vld [vmem:[%s3494_s1 + $0x120] sm:$0xff]  ;;  %v1182_v18 = vld [vmem:[%s3494_s1 + $0x18] sm:$0xff] }
 0x1c3   :  { %vm929_vm14 = vcmp.lt.s32.totalorder %v928_v34, %v657_v49  ;;  %1380 = vmatpush.msrb.mxu2 %v1219_v22  ;;  %1445 = vmatpush.msrb.mxu3 %v1235_v5  ;;  %v1230_v40 = vld [vmem:[%s3494_s1 + $0x198] sm:$0xff]  ;;  %v1213_v5 = vld [vmem:[%s3494_s1 + $0x110] sm:$0xff] }
 0x1c4   :  { %v930_v47 = vsel %vm929_vm14, %v928_v34, %v657_v49  ;;  %917 = vmin.xlane.f32.xlu2 %v2944_v46  ;;  %1251 = vmatpush.msrb.mxu0 %v1186_v12  ;;  %v1198_v34 = vld [vmem:[%s3494_s1 + $0x98] sm:$0xff]  ;;  %v1229_v12 = vld [vmem:[%s3494_s1 + $0x190] sm:$0xff] }
 0x1c5   :  { %vm931_vm15 = vcmp.lt.s32.totalorder %v930_v47, %v658_v24  ;;  %1316 = vmatpush.msrb.mxu1 %v1202_v13  ;;  %1381 = vmatpush.msrb.mxu2 %v1218_v4  ;;  %v1180_v13 = vld [vmem:[%s3494_s1 + $0x8] sm:$0xff] }
 0x1c6   :  { %v2969_v16 = vpop.xlane.xlu2 %817  ;;  %v533_v9 = vpop.xlane.xlu1 %532  ;;  %v2971_v58 = vsel %vm931_vm15, %v930_v47, %v658_v24  ;;  %1446 = vmatpush.msrb.mxu3 %v1234_v6  ;;  %1252 = vmatpush.msrb.mxu0 %v1185_v36  ;;  %v1181_v24 = vld [vmem:[%s3494_s1 + $0x10] sm:$0xff]  ;;  %v1196_v4 = vld [vmem:[%s3494_s1 + $0x88] sm:$0xff]  ;;  %v1179_v36 = vld [vmem:[%s3494_s1] sm:$0xff] }
 0x1c7   :  { %vm595_vm1 = vcmp.eq.f32.partialorder %v2681_v2, %v533_v9  ;;  %vm596_vm2 = vcmp.eq.f32.partialorder %v2687_v59, %v533_v9  ;;  %vm597_vm3 = vcmp.eq.f32.partialorder %v2703_v29, %v533_v9  ;;  %v1233_v2 = vld [vmem:[%s3494_s1 + $0x1b0] sm:$0xff]  ;;  %vm598_vm4 = vcmp.eq.f32.partialorder %v2715_v50, %v533_v9  ;;  %1317 = vmatpush.msrb.mxu1 %v1201_v53  ;;  %v1183_v29 = vld [vmem:[%s3494_s1 + $0x20] sm:$0xff]  ;;  %v1212_v9 = vld [vmem:[%s3494_s1 + $0x108] sm:$0xff] }
 0x1c8   :  { %v659_v37 = vsel %vm595_vm1, %v2491_v39, 512  ;;  %v660_v11 = vsel %vm596_vm2, %v2494_v43, 512  ;;  %vm819_vm6 = vcmp.eq.f32.partialorder %v2734_v19, %v2969_v16  ;;  %v934_v59 = vshra.s32 %v2971_v58, 16  ;;  %1382 = vmatpush.msrb.mxu2 %v1217_v41  ;;  %v1216_v19 = vld [vmem:[%s3494_s1 + $0x128] sm:$0xff]  ;;  %1447 = vmatpush.msrb.mxu3 %v1233_v2  ;;  %v1231_v50 = vld [vmem:[%s3494_s1 + $0x1a0] sm:$0xff]  ;;  %v1197_v47 = vld [vmem:[%s3494_s1 + $0x90] sm:$0xff] }
 0x1c9   :  { %vm947_vm5 = vcmp.lt.s32.totalorder %v659_v37, %v660_v11  ;;  %v661_v3 = vsel %vm597_vm3, %v2497_v54, 512  ;;  %v820_v62 = vsel %vm819_vm6, %v815_v14, inf  ;;  %v662_v56 = vsel %vm598_vm4, %v2505_v0, 512  ;;  %1253 = vmatpush.msrb.mxu0 %v1184_v63  ;;  %1318 = vmatpush.msrb.mxu1 %v1200_v52  ;;  %v1228_v6 = vld [vmem:[%s3494_s1 + $0x188] sm:$0xff]  ;;  %v1195_v53 = vld [vmem:[%s3494_s1 + $0x80] sm:$0xff] }
 0x1ca   :  { %v948_v61 = vsel %vm947_vm5, %v659_v37, %v660_v11  ;;  %821 = vmin.xlane.f32.xlu0 %v820_v62  ;;  %v3009_v45 = vcvt.s32.f32 %v934_v59  ;;  %1383 = vmatpush.msrb.mxu2 %v1216_v19  ;;  %v1211_v41 = vld [vmem:[%s3494_s1 + $0x100] sm:$0xff]  ;;  %v684_v14 = vcvt.f32.s32 %v2743_v21  ;;  %v2098_v21 = vmov 1.0  }
 0x1cb   :  { %vm949_vm7 = vcmp.lt.s32.totalorder %v948_v61, %v661_v3  ;;  %1448 = vmatpush.msrb.mxu3 %v1232_v10  ;;  %1254 = vmatpush.msrb.mxu0 %v1183_v29  ;;  %v1227_v37 = vld [vmem:[%s3494_s1 + $0x180] sm:$0xff]  ;;  %v704_v29 = vcvt.f32.s32 %v2748_v1 }
 0x1cc   :  { %v950_v8 = vsel %vm949_vm7, %v948_v61, %v661_v3  ;;  %937 = vmin.xlane.f32.xlu1 %v3009_v45  ;;  %1319 = vmatpush.msrb.mxu1 %v1199_v7  ;;  %v685_v52 = vshll.u32 %v684_v14, 16 }
 0x1cd   :  { %vm951_vm8 = vcmp.lt.s32.totalorder %v950_v8, %v662_v56  ;;  %1384 = vmatpush.msrb.mxu2 %v1215_v42  ;;  %1449 = vmatpush.msrb.mxu3 %v1231_v50  ;;  %v705_v50 = vshll.u32 %v704_v29, 16 }
 0x1ce   :  { %v3030_v49 = vsel %vm951_vm8, %v950_v8, %v662_v56  ;;  %1255 = vmatpush.msrb.mxu0 %v1182_v18  ;;  %1320 = vmatpush.msrb.mxu1 %v1198_v34  ;;  %v538_v11 = vpop.xlane.xlu1 %537 }
 0x1cf   :  { %v954_v22 = vshra.s32 %v3030_v49, 16  ;;  %1385 = vmatpush.msrb.mxu2 %v1214_v27  ;;  %1450 = vmatpush.msrb.mxu3 %v1230_v40  ;;  %vm599_vm9 = vcmp.eq.f32.partialorder %v2719_v35, %v538_v11  ;;  %vm600_vm10 = vcmp.eq.f32.partialorder %v2722_v30, %v538_v11  ;;  %vm601_vm12 = vcmp.eq.f32.partialorder %v2732_v44, %v538_v11 }
 0x1d0   :  { %1256 = vmatpush.msrb.mxu0 %v1181_v24  ;;  %1321 = vmatpush.msrb.mxu1 %v1197_v47  ;;  %v663_v2 = vsel %vm599_vm9, %v2491_v39, 512  ;;  %v664_v59 = vsel %vm600_vm10, %v2494_v43, 512  ;;  %v2097_v35 = vmov 0.0   ;;  %v665_v56 = vsel %vm601_vm12, %v2497_v54, 512 }
 0x1d1   :  { %v3045_v25 = vcvt.s32.f32 %v954_v22  ;;  %1386 = vmatpush.msrb.mxu2 %v1213_v5  ;;  %1451 = vmatpush.msrb.mxu3 %v1229_v12  ;;  %vm967_vm11 = vcmp.lt.s32.totalorder %v663_v2, %v664_v59  ;;  %vm602_vm3 = vcmp.eq.f32.partialorder %v2739_v20, %v538_v11  ;;  %v724_v40 = vcvt.f32.s32 %v2761_v60 }
 0x1d2   :  { %1257 = vmatpush.msrb.mxu0 %v1180_v13  ;;  %1322 = vmatpush.msrb.mxu1 %v1196_v4  ;;  %v968_v61 = vsel %vm967_vm11, %v663_v2, %v664_v59  ;;  %v666_v1 = vsel %vm602_vm3, %v2505_v0, 512  ;;  %v833_v22 = vand.u32 65535, %v2763_v32  ;;  %v744_v2 = vcvt.f32.s32 %v2780_v17 }
 0x1d3   :  { %957 = vmin.xlane.f32.xlu0 %v3045_v25  ;;  %1387 = vmatpush.msrb.mxu2 %v1212_v9  ;;  %vm969_vm2 = vcmp.lt.s32.totalorder %v968_v61, %v665_v56 }
 0x1d4   :  { %1452 = vmatpush.msrb.mxu3 %v1228_v6  ;;  %1258 = vmatpush.msrb.mxu0 %v1179_v36  ;;  %v970_v34 = vsel %vm969_vm2, %v968_v61, %v665_v56  ;;  %v725_v36 = vshll.u32 %v724_v40, 16 }
 0x1d5   :  { %1323 = vmatpush.msrb.mxu1 %v1195_v53  ;;  %1388 = vmatpush.msrb.mxu2 %v1211_v41  ;;  %vm971_vm4 = vcmp.lt.s32.totalorder %v970_v34, %v666_v1 }
 0x1d6   :  { %1453 = vmatpush.msrb.mxu3 %v1227_v37  ;;  %v835_v37 = vcvt.s32.f32 %v833_v22  ;;  %v3123_v11 = vsel %vm971_vm4, %v970_v34, %v666_v1  ;;  %v764_v34 = vcvt.f32.s32 %v2799_v55  ;;  %v873_v1 = vand.u32 65535, %v2801_v28 }
 0x204   :  { %v682_v63 = vpop.xlane.xlu0 %681 }
 0x205   :  { %v683_v3 = vcvt.f32.s32 %v682_v63  ;;  %v853_v63 = vand.u32 65535, %v2782_v15 }
 0x207   :  { %v686_v62 = vadd.s32 %v685_v52, %v683_v3  ;;  %v974_v52 = vshra.s32 %v3123_v11, 16 }
 0x209   :  { %vm987_vm13 = vcmp.eq.s32.totalorder %v2491_v39, %v686_v62  ;;  %vm988_vm14 = vcmp.eq.s32.totalorder %v2494_v43, %v686_v62  ;;  %vm989_vm15 = vcmp.eq.s32.totalorder %v2497_v54, %v686_v62  ;;  %vm990_vm1 = vcmp.eq.s32.totalorder %v2505_v0, %v686_v62 }
 0x20a   :  { %v1895_v30 = vsel %vm987_vm13, 1.0, %v2097_v35  ;;  %1959 = vmatmul.msk.f32.vlgmr.msrb.gmra.mxu0 %vm987_vm13, %v2098_v21  ;;  %v1896_v19 = vsel %vm988_vm14, 1.0, %v2097_v35  ;;  %1975 = vmatmul.msk.f32.vlgmr.msrb.gmra.mxu1 %vm988_vm14, %v2098_v21  ;;  %v1897_v44 = vsel %vm989_vm15, 1.0, %v2097_v35  ;;  %v1898_v10 = vsel %vm990_vm1, 1.0, %v2097_v35 }
 0x20b   :  { %v1725_v8 = vpack.c.bf16 %v1896_v19, %v1895_v30  ;;  %1991 = vmatmul.msk.f32.vlgmr.msrb.gmra.mxu2 %vm989_vm15, %v2098_v21  ;;  %2007 = vmatmul.msk.f32.vlgmr.msrb.gmra.mxu3 %vm990_vm1, %v2098_v21  ;;  %v1726_v7 = vpack.c.bf16 %v1898_v10, %v1897_v44 }
 0x20d   :  { %1757 = vst [vmem:[#allocation2] sm:$0xff] %v1725_v8  ;;  %v702_v42 = vpop.xlane.xlu0 %701 }
 0x20e   :  { %1758 = vst [vmem:[#allocation2 + $0x8] sm:$0xff] %v1726_v7  ;;  %v703_v18 = vcvt.f32.s32 %v702_v42  ;;  %v855_v42 = vcvt.s32.f32 %v853_v63 }
 0x210   :  { %v706_v27 = vadd.s32 %v705_v50, %v703_v18  ;;  %v3146_v18 = vcvt.s32.f32 %v974_v52 }
 0x212   :  { %vm991_vm5 = vcmp.eq.s32.totalorder %v2491_v39, %v706_v27  ;;  %vm992_vm6 = vcmp.eq.s32.totalorder %v2494_v43, %v706_v27  ;;  %vm993_vm7 = vcmp.eq.s32.totalorder %v2497_v54, %v706_v27  ;;  %vm994_vm8 = vcmp.eq.s32.totalorder %v2505_v0, %v706_v27 }
 0x213   :  { %v1899_v20 = vsel %vm991_vm5, 1.0, %v2097_v35  ;;  %1960 = vmatmul.msk.f32.gmra.mxu0 %vm991_vm5, %v2098_v21  ;;  %v1900_v24 = vsel %vm992_vm6, 1.0, %v2097_v35  ;;  %1976 = vmatmul.msk.f32.gmra.mxu1 %vm992_vm6, %v2098_v21  ;;  %v1901_v60 = vsel %vm993_vm7, 1.0, %v2097_v35  ;;  %v1902_v32 = vsel %vm994_vm8, 1.0, %v2097_v35 }
 0x214   :  { %v1606_v47 = vadd.f32 %v1899_v20, %v1895_v30  ;;  %v1627_v5 = vadd.f32 %v1900_v24, %v1896_v19  ;;  %v1727_v12 = vpack.c.bf16 %v1900_v24, %v1899_v20  ;;  %1992 = vmatmul.msk.f32.gmra.mxu2 %vm993_vm7, %v2098_v21  ;;  %v1648_v13 = vadd.f32 %v1901_v60, %v1897_v44 }
 0x215   :  { %2008 = vmatmul.msk.f32.gmra.mxu3 %vm994_vm8, %v2098_v21  ;;  %v1669_v4 = vadd.f32 %v1902_v32, %v1898_v10  ;;  %v1728_v9 = vpack.c.bf16 %v1902_v32, %v1901_v60  ;;  %v722_v6 = vpop.xlane.xlu0 %721  ;;  %v745_v10 = vshll.u32 %v744_v2, 16 }
 0x216   :  { %1759 = vst [vmem:[#allocation2 + $0x10] sm:$0xff] %v1727_v12  ;;  %v723_v53 = vcvt.f32.s32 %v722_v6 }
 0x217   :  { %1760 = vst [vmem:[#allocation2 + $0x18] sm:$0xff] %v1728_v9  ;;  %v3120_v41 = vpop.xlane.xlu2 %837  ;;  %v875_v9 = vcvt.s32.f32 %v873_v1 }
 0x218   :  { %v726_v14 = vadd.s32 %v725_v36, %v723_v53  ;;  %vm839_vm9 = vcmp.eq.f32.partialorder %v2775_v38, %v3120_v41  ;;  %v784_v36 = vcvt.f32.s32 %v2836_v23 }
 0x219   :  { %v840_v59 = vsel %vm839_vm9, %v835_v37, inf  ;;  %v893_v37 = vand.u32 65535, %v2838_v33 }
 0x21a   :  { %841 = vmin.xlane.f32.xlu2 %v840_v59  ;;  %vm995_vm10 = vcmp.eq.s32.totalorder %v2491_v39, %v726_v14  ;;  %vm996_vm11 = vcmp.eq.s32.totalorder %v2494_v43, %v726_v14  ;;  %vm997_vm12 = vcmp.eq.s32.totalorder %v2497_v54, %v726_v14  ;;  %vm998_vm13 = vcmp.eq.s32.totalorder %v2505_v0, %v726_v14 }
 0x21b   :  { %v1903_v3 = vsel %vm995_vm10, 1.0, %v2097_v35  ;;  %1961 = vmatmul.msk.f32.gmra.mxu0 %vm995_vm10, %v2098_v21  ;;  %v1904_v38 = vsel %vm996_vm11, 1.0, %v2097_v35  ;;  %1977 = vmatmul.msk.f32.gmra.mxu1 %vm996_vm11, %v2098_v21  ;;  %v1905_v17 = vsel %vm997_vm12, 1.0, %v2097_v35  ;;  %v1906_v19 = vsel %vm998_vm13, 1.0, %v2097_v35 }
 0x21c   :  { %v1607_v15 = vadd.f32 %v1903_v3, %v1606_v47  ;;  %v1628_v62 = vadd.f32 %v1904_v38, %v1627_v5  ;;  %v1729_v61 = vpack.c.bf16 %v1904_v38, %v1903_v3  ;;  %1993 = vmatmul.msk.f32.gmra.mxu2 %vm997_vm12, %v2098_v21  ;;  %v1649_v30 = vadd.f32 %v1905_v17, %v1648_v13 }
 0x21d   :  { %2009 = vmatmul.msk.f32.gmra.mxu3 %vm998_vm13, %v2098_v21  ;;  %v742_v44 = vpop.xlane.xlu0 %741  ;;  %v1670_v29 = vadd.f32 %v1906_v19, %v1669_v4  ;;  %v1730_v56 = vpack.c.bf16 %v1906_v19, %v1905_v17  ;;  %v765_v47 = vshll.u32 %v764_v34, 16  ;;  %v785_v38 = vshll.u32 %v784_v36, 16 }
 0x21e   :  { %1761 = vst [vmem:[#allocation2 + $0x20] sm:$0xff] %v1729_v61  ;;  %v743_v8 = vcvt.f32.s32 %v742_v44  ;;  %v804_v44 = vcvt.f32.s32 %v2904_v48 }
 0x21f   :  { %v3142_v7 = vpop.xlane.xlu2 %857  ;;  %1762 = vst [vmem:[#allocation2 + $0x28] sm:$0xff] %v1730_v56 }
 0x220   :  { %v746_v50 = vadd.s32 %v745_v10, %v743_v8  ;;  %vm859_vm14 = vcmp.eq.f32.partialorder %v2794_v26, %v3142_v7  ;;  %v805_v1 = vshll.u32 %v804_v44, 16 }
 0x221   :  { %v860_v27 = vsel %vm859_vm14, %v855_v42, inf }
 0x222   :  { %861 = vmin.xlane.f32.xlu1 %v860_v27  ;;  %977 = vmin.xlane.f32.xlu2 %v3146_v18  ;;  %vm999_vm15 = vcmp.eq.s32.totalorder %v2491_v39, %v746_v50  ;;  %vm1000_vm1 = vcmp.eq.s32.totalorder %v2494_v43, %v746_v50  ;;  %vm1001_vm2 = vcmp.eq.s32.totalorder %v2497_v54, %v746_v50 }
 0x223   :  { %v1907_v40 = vsel %vm999_vm15, 1.0, %v2097_v35  ;;  %1962 = vmatmul.msk.f32.gmra.mxu0 %vm999_vm15, %v2098_v21  ;;  %v1908_v26 = vsel %vm1000_vm1, 1.0, %v2097_v35  ;;  %1978 = vmatmul.msk.f32.gmra.mxu1 %vm1000_vm1, %v2098_v21  ;;  %v1909_v55 = vsel %vm1001_vm2, 1.0, %v2097_v35  ;;  %vm1002_vm3 = vcmp.eq.s32.totalorder %v2505_v0, %v746_v50 }
 0x224   :  { %v1608_v22 = vadd.f32 %v1907_v40, %v1607_v15  ;;  %v1629_v20 = vadd.f32 %v1908_v26, %v1628_v62  ;;  %v1731_v24 = vpack.c.bf16 %v1908_v26, %v1907_v40  ;;  %1994 = vmatmul.msk.f32.gmra.mxu2 %vm1001_vm2, %v2098_v21  ;;  %v1650_v60 = vadd.f32 %v1909_v55, %v1649_v30 }
 0x225   :  { %v1910_v28 = vsel %vm1002_vm3, 1.0, %v2097_v35  ;;  %2010 = vmatmul.msk.f32.gmra.mxu3 %vm1002_vm3, %v2098_v21  ;;  %v762_v32 = vpop.xlane.xlu0 %761  ;;  %v895_v30 = vcvt.s32.f32 %v893_v37 }
 0x226   :  { %1763 = vst [vmem:[#allocation2 + $0x30] sm:$0xff] %v1731_v24  ;;  %v1671_v5 = vadd.f32 %v1910_v28, %v1670_v29  ;;  %v1732_v12 = vpack.c.bf16 %v1910_v28, %v1909_v55  ;;  %v763_v13 = vcvt.f32.s32 %v762_v32  ;;  %v913_v29 = vand.u32 65535, %v2906_v57 }
 0x227   :  { %v3163_v4 = vpop.xlane.xlu1 %877  ;;  %v933_v32 = vand.u32 65535, %v2971_v58 }
 0x228   :  { %1764 = vst [vmem:[#allocation2 + $0x38] sm:$0xff] %v1732_v12  ;;  %v766_v6 = vadd.s32 %v765_v47, %v763_v13  ;;  %vm879_vm4 = vcmp.eq.f32.partialorder %v2813_v31, %v3163_v4 }
 0x229   :  { %v880_v53 = vsel %vm879_vm4, %v875_v9, inf }
 0x22a   :  { %881 = vmin.xlane.f32.xlu0 %v880_v53  ;;  %vm1003_vm5 = vcmp.eq.s32.totalorder %v2491_v39, %v766_v6  ;;  %vm1004_vm6 = vcmp.eq.s32.totalorder %v2494_v43, %v766_v6  ;;  %vm1005_vm7 = vcmp.eq.s32.totalorder %v2497_v54, %v766_v6  ;;  %vm1006_vm8 = vcmp.eq.s32.totalorder %v2505_v0, %v766_v6 }
 0x22b   :  { %v1911_v14 = vsel %vm1003_vm5, 1.0, %v2097_v35  ;;  %1963 = vmatmul.msk.f32.gmra.mxu0 %vm1003_vm5, %v2098_v21  ;;  %v1912_v2 = vsel %vm1004_vm6, 1.0, %v2097_v35  ;;  %1979 = vmatmul.msk.f32.gmra.mxu1 %vm1004_vm6, %v2098_v21  ;;  %v1913_v31 = vsel %vm1005_vm7, 1.0, %v2097_v35  ;;  %v1914_v33 = vsel %vm1006_vm8, 1.0, %v2097_v35 }
 0x22c   :  { %v1609_v23 = vadd.f32 %v1911_v14, %v1608_v22  ;;  %v1630_v59 = vadd.f32 %v1912_v2, %v1629_v20  ;;  %v1733_v63 = vpack.c.bf16 %v1912_v2, %v1911_v14  ;;  %1995 = vmatmul.msk.f32.gmra.mxu2 %vm1005_vm7, %v2098_v21  ;;  %v1651_v52 = vadd.f32 %v1913_v31, %v1650_v60 }
 0x22d   :  { %2011 = vmatmul.msk.f32.gmra.mxu3 %vm1006_vm8, %v2098_v21  ;;  %v782_v3 = vpop.xlane.xlu2 %781  ;;  %v1672_v17 = vadd.f32 %v1914_v33, %v1671_v5  ;;  %v1734_v15 = vpack.c.bf16 %v1914_v33, %v1913_v31  ;;  %v915_v20 = vcvt.s32.f32 %v913_v29  ;;  %v824_v60 = vcvt.f32.s32 %v2969_v16 }
 0x22e   :  { %1765 = vst [vmem:[#allocation2 + $0x40] sm:$0xff] %v1733_v63  ;;  %v783_v62 = vcvt.f32.s32 %v782_v3  ;;  %v935_v31 = vcvt.s32.f32 %v933_v32  ;;  %v953_v63 = vand.u32 65535, %v3030_v49 }
 0x22f   :  { %v3181_v61 = vpop.xlane.xlu0 %897  ;;  %1766 = vst [vmem:[#allocation2 + $0x48] sm:$0xff] %v1734_v15  ;;  %v825_v36 = vshll.u32 %v824_v60, 16 }
 0x230   :  { %v786_v19 = vadd.s32 %v785_v38, %v783_v62  ;;  %vm899_vm9 = vcmp.eq.f32.partialorder %v2879_v51, %v3181_v61  ;;  %v955_v44 = vcvt.s32.f32 %v953_v63 }
 0x231   :  { %v900_v10 = vsel %vm899_vm9, %v895_v30, inf }
 0x232   :  { %901 = vmin.xlane.f32.xlu1 %v900_v10  ;;  %vm1007_vm10 = vcmp.eq.s32.totalorder %v2491_v39, %v786_v19  ;;  %vm1008_vm11 = vcmp.eq.s32.totalorder %v2494_v43, %v786_v19  ;;  %vm1009_vm12 = vcmp.eq.s32.totalorder %v2497_v54, %v786_v19  ;;  %vm1010_vm13 = vcmp.eq.s32.totalorder %v2505_v0, %v786_v19 }
 0x233   :  { %v1915_v56 = vsel %vm1007_vm10, 1.0, %v2097_v35  ;;  %1964 = vmatmul.msk.f32.gmra.mxu0 %vm1007_vm10, %v2098_v21  ;;  %v1916_v8 = vsel %vm1008_vm11, 1.0, %v2097_v35  ;;  %1980 = vmatmul.msk.f32.gmra.mxu1 %vm1008_vm11, %v2098_v21  ;;  %v1917_v51 = vsel %vm1009_vm12, 1.0, %v2097_v35  ;;  %v1918_v57 = vsel %vm1010_vm13, 1.0, %v2097_v35 }
 0x234   :  { %v1610_v48 = vadd.f32 %v1915_v56, %v1609_v23  ;;  %v1631_v42 = vadd.f32 %v1916_v8, %v1630_v59  ;;  %v1735_v50 = vpack.c.bf16 %v1916_v8, %v1915_v56  ;;  %1996 = vmatmul.msk.f32.gmra.mxu2 %vm1009_vm12, %v2098_v21  ;;  %v1652_v34 = vadd.f32 %v1917_v51, %v1651_v52 }
 0x235   :  { %2012 = vmatmul.msk.f32.gmra.mxu3 %vm1010_vm13, %v2098_v21  ;;  %v802_v27 = vpop.xlane.xlu1 %801  ;;  %v1673_v40 = vadd.f32 %v1918_v57, %v1672_v17  ;;  %v1736_v26 = vpack.c.bf16 %v1918_v57, %v1917_v51  ;;  %v844_v8 = vcvt.f32.s32 %v3120_v41  ;;  %v2029_v41 = vld [vmem:[%s3493_s0] sm:$0xff] }
 0x236   :  { %1767 = vst [vmem:[#allocation2 + $0x50] sm:$0xff] %v1735_v50  ;;  %v803_v55 = vcvt.f32.s32 %v802_v27  ;;  %v973_v50 = vand.u32 65535, %v3123_v11 }
 0x237   :  { %v3199_v22 = vpop.xlane.xlu2 %917  ;;  %1768 = vst [vmem:[#allocation2 + $0x58] sm:$0xff] %v1736_v26 }
 0x238   :  { %v806_v24 = vadd.s32 %v805_v1, %v803_v55  ;;  %vm919_vm14 = vcmp.eq.f32.partialorder %v2944_v46, %v3199_v22 }
 0x239   :  { %v920_v28 = vsel %vm919_vm14, %v915_v20, inf  ;;  %v864_v20 = vcvt.f32.s32 %v3142_v7 }
 0x23a   :  { %921 = vmin.xlane.f32.xlu2 %v920_v28  ;;  %vm1011_vm15 = vcmp.eq.s32.totalorder %v2491_v39, %v806_v24  ;;  %vm1012_vm1 = vcmp.eq.s32.totalorder %v2494_v43, %v806_v24  ;;  %vm1013_vm2 = vcmp.eq.s32.totalorder %v2497_v54, %v806_v24  ;;  %vm1014_vm3 = vcmp.eq.s32.totalorder %v2505_v0, %v806_v24 }
 0x23b   :  { %v1919_v47 = vsel %vm1011_vm15, 1.0, %v2097_v35  ;;  %1965 = vmatmul.msk.f32.gmra.mxu0 %vm1011_vm15, %v2098_v21  ;;  %v1920_v5 = vsel %vm1012_vm1, 1.0, %v2097_v35  ;;  %1981 = vmatmul.msk.f32.gmra.mxu1 %vm1012_vm1, %v2098_v21  ;;  %v1921_v46 = vsel %vm1013_vm2, 1.0, %v2097_v35  ;;  %v1922_v58 = vsel %vm1014_vm3, 1.0, %v2097_v35 }
 0x23c   :  { %v1611_v16 = vadd.f32 %v1919_v47, %v1610_v48  ;;  %v1632_v12 = vadd.f32 %v1920_v5, %v1631_v42  ;;  %v1737_v13 = vpack.c.bf16 %v1920_v5, %v1919_v47  ;;  %1997 = vmatmul.msk.f32.gmra.mxu2 %vm1013_vm2, %v2098_v21  ;;  %v1653_v9 = vadd.f32 %v1921_v46, %v1652_v34 }
 0x23d   :  { %2013 = vmatmul.msk.f32.gmra.mxu3 %vm1014_vm3, %v2098_v21  ;;  %v822_v6 = vpop.xlane.xlu0 %821  ;;  %v1674_v53 = vadd.f32 %v1922_v58, %v1673_v40  ;;  %v1738_v37 = vpack.c.bf16 %v1922_v58, %v1921_v46  ;;  %v845_v34 = vshll.u32 %v844_v8, 16  ;;  %v975_v24 = vcvt.s32.f32 %v973_v50 }
 0x23e   :  { %1769 = vst [vmem:[#allocation2 + $0x60] sm:$0xff] %v1737_v13  ;;  %v823_v14 = vcvt.f32.s32 %v822_v6 }
 0x23f   :  { %v3217_v2 = vpop.xlane.xlu1 %937  ;;  %1770 = vst [vmem:[#allocation2 + $0x68] sm:$0xff] %v1738_v37 }
 0x240   :  { %v826_v23 = vadd.s32 %v825_v36, %v823_v14  ;;  %vm939_vm4 = vcmp.eq.f32.partialorder %v3009_v45, %v3217_v2 }
 0x241   :  { %v940_v59 = vsel %vm939_vm4, %v935_v31, inf }
 0x242   :  { %941 = vmin.xlane.f32.xlu0 %v940_v59  ;;  %vm1015_vm5 = vcmp.eq.s32.totalorder %v2491_v39, %v826_v23  ;;  %vm1016_vm6 = vcmp.eq.s32.totalorder %v2494_v43, %v826_v23  ;;  %vm1017_vm7 = vcmp.eq.s32.totalorder %v2497_v54, %v826_v23  ;;  %vm1018_vm8 = vcmp.eq.s32.totalorder %v2505_v0, %v826_v23 }
 0x243   :  { %v1923_v52 = vsel %vm1015_vm5, 1.0, %v2097_v35  ;;  %1966 = vmatmul.msk.f32.gmra.mxu0 %vm1015_vm5, %v2098_v21  ;;  %v1924_v33 = vsel %vm1016_vm6, 1.0, %v2097_v35  ;;  %1982 = vmatmul.msk.f32.gmra.mxu1 %vm1016_vm6, %v2098_v21  ;;  %v1925_v45 = vsel %vm1017_vm7, 1.0, %v2097_v35  ;;  %v1926_v49 = vsel %vm1018_vm8, 1.0, %v2097_v35 }
 0x244   :  { %v1612_v3 = vadd.f32 %v1923_v52, %v1611_v16  ;;  %v1633_v38 = vadd.f32 %v1924_v33, %v1632_v12  ;;  %v1739_v17 = vpack.c.bf16 %v1924_v33, %v1923_v52  ;;  %1998 = vmatmul.msk.f32.gmra.mxu2 %vm1017_vm7, %v2098_v21  ;;  %v1654_v15 = vadd.f32 %v1925_v45, %v1653_v9 }
 0x245   :  { %2014 = vmatmul.msk.f32.gmra.mxu3 %vm1018_vm8, %v2098_v21  ;;  %v1675_v62 = vadd.f32 %v1926_v49, %v1674_v53  ;;  %v1740_v30 = vpack.c.bf16 %v1926_v49, %v1925_v45  ;;  %v865_v16 = vshll.u32 %v864_v20, 16  ;;  %v884_v12 = vcvt.f32.s32 %v3163_v4 }
 0x246   :  { %1771 = vst [vmem:[#allocation2 + $0x70] sm:$0xff] %v1739_v17  ;;  %v3234_v19 = vpop.xlane.xlu0 %957 }
 0x247   :  { %vm959_vm9 = vcmp.eq.f32.partialorder %v3045_v25, %v3234_v19  ;;  %1772 = vst [vmem:[#allocation2 + $0x78] sm:$0xff] %v1740_v30 }
 0x248   :  { %v960_v10 = vsel %vm959_vm9, %v955_v44, inf }
 0x249   :  { %961 = vmin.xlane.f32.xlu1 %v960_v10  ;;  %v904_v10 = vcvt.f32.s32 %v3181_v61 }
 0x24b   :  { %v905_v20 = vshll.u32 %v904_v10, 16 }
 0x287   :  { %v1260_v29 = vpop.f32.mrf.mxu0  ;;  %v1325_v56 = vpop.f32.mrf.mxu1 }
 0x288   :  { %v1326_v51 = vadd.f32 %v1325_v56, %v1260_v29 }
 0x28d   :  { %v842_v48 = vpop.xlane.xlu2 %841 }
 0x28e   :  { %v1390_v42 = vpop.f32.mrf.mxu2  ;;  %v843_v57 = vcvt.f32.s32 %v842_v48  ;;  %v1455_v1 = vpop.f32.mrf.mxu3 }
 0x28f   :  { %v1391_v27 = vadd.f32 %v1390_v42, %v1326_v51 }
 0x290   :  { %v846_v40 = vadd.s32 %v845_v34, %v843_v57  ;;  %v1263_v55 = vpop.f32.mrf.mxu0  ;;  %v1328_v25 = vpop.f32.mrf.mxu1 }
 0x291   :  { %v1456_v26 = vadd.f32 %v1455_v1, %v1391_v27  ;;  %v1329_v36 = vadd.f32 %v1328_v25, %v1263_v55 }
 0x292   :  { %vm1019_vm10 = vcmp.eq.s32.totalorder %v2491_v39, %v846_v40  ;;  %vm1020_vm11 = vcmp.eq.s32.totalorder %v2494_v43, %v846_v40  ;;  %vm1021_vm12 = vcmp.eq.s32.totalorder %v2497_v54, %v846_v40  ;;  %vm1022_vm13 = vcmp.eq.s32.totalorder %v2505_v0, %v846_v40 }
 0x293   :  { %v1503_v60 = vsub.f32 %v1456_v26, %v2029_v41  ;;  %1709 = vst.msk [vmem:[%s3497_s4] sm:$0xff] %vm71_vm0, %v1456_v26  ;;  %v1927_v11 = vsel %vm1019_vm10, 1.0, %v2097_v35  ;;  %1967 = vmatmul.msk.f32.gmra.mxu0 %vm1019_vm10, %v2098_v21  ;;  %v1928_v7 = vsel %vm1020_vm11, 1.0, %v2097_v35  ;;  %1983 = vmatmul.msk.f32.gmra.mxu1 %vm1020_vm11, %v2098_v21  ;;  %v1929_v28 = vsel %vm1021_vm12, 1.0, %v2097_v35 }
 0x294   :  { %v1613_v32 = vadd.f32 %v1927_v11, %v1612_v3  ;;  %v1634_v47 = vadd.f32 %v1928_v7, %v1633_v38  ;;  %v1741_v5 = vpack.c.bf16 %v1928_v7, %v1927_v11  ;;  %1999 = vmatmul.msk.f32.gmra.mxu2 %vm1021_vm12, %v2098_v21  ;;  %v1655_v46 = vadd.f32 %v1929_v28, %v1654_v15  ;;  %v2030_v15 = vld [vmem:[%s3493_s0 + $0x8] sm:$0xff]  ;;  %v2031_v11 = vld [vmem:[%s3493_s0 + $0x10] sm:$0xff] }
 0x295   :  { %v1930_v13 = vsel %vm1022_vm13, 1.0, %v2097_v35  ;;  %2015 = vmatmul.msk.f32.gmra.mxu3 %vm1022_vm13, %v2098_v21  ;;  %v3261_v9 = vpop.xlane.xlu2 %977  ;;  %v862_v58 = vpop.xlane.xlu1 %861  ;;  %v1519_v6 = vmul.f32 %v1503_v60, %v1503_v60  ;;  %v885_v3 = vshll.u32 %v884_v12, 16 }
 0x296   :  { %1773 = vst [vmem:[#allocation2 + $0x80] sm:$0xff] %v1741_v5  ;;  %v1676_v53 = vadd.f32 %v1930_v13, %v1675_v62  ;;  %v1742_v37 = vpack.c.bf16 %v1930_v13, %v1929_v28  ;;  %v863_v14 = vcvt.f32.s32 %v862_v58  ;;  %vm979_vm14 = vcmp.eq.f32.partialorder %v3146_v18, %v3261_v9 }
 0x297   :  { %v1393_v31 = vpop.f32.mrf.mxu2  ;;  %v1535_v23 = vsel %vm71_vm0, %v1519_v6, 0.0  ;;  %v980_v33 = vsel %vm979_vm14, %v975_v24, inf  ;;  %v924_v5 = vcvt.f32.s32 %v3199_v22 }
 0x298   :  { %1774 = vst [vmem:[#allocation2 + $0x88] sm:$0xff] %v1742_v37  ;;  %v866_v4 = vadd.s32 %v865_v16, %v863_v14  ;;  %v1394_v59 = vadd.f32 %v1393_v31, %v1329_v36  ;;  %v1458_v63 = vpop.f32.mrf.mxu3  ;;  %v1266_v52 = vpop.f32.mrf.mxu0  ;;  %1536 = vadd.xlane.f32.xlu0 %v1535_v23  ;;  %981 = vmin.xlane.f32.xlu2 %v980_v33 }
 0x299   :  { %v1331_v45 = vpop.f32.mrf.mxu1 }
 0x29a   :  { %v1459_v38 = vadd.f32 %v1458_v63, %v1394_v59  ;;  %vm1023_vm15 = vcmp.eq.s32.totalorder %v2491_v39, %v866_v4  ;;  %vm1024_vm1 = vcmp.eq.s32.totalorder %v2494_v43, %v866_v4  ;;  %vm1025_vm2 = vcmp.eq.s32.totalorder %v2497_v54, %v866_v4 }
 0x29b   :  { %v1931_v17 = vsel %vm1023_vm15, 1.0, %v2097_v35  ;;  %1968 = vmatmul.msk.f32.gmra.mxu0 %vm1023_vm15, %v2098_v21  ;;  %v1932_v18 = vsel %vm1024_vm1, 1.0, %v2097_v35  ;;  %1984 = vmatmul.msk.f32.gmra.mxu1 %vm1024_vm1, %v2098_v21  ;;  %vm1026_vm3 = vcmp.eq.s32.totalorder %v2505_v0, %v866_v4  ;;  %v1332_v29 = vadd.f32 %v1331_v45, %v1266_v52 }
 0x29c   :  { %v1504_v49 = vsub.f32 %v1459_v38, %v2030_v15  ;;  %1710 = vst.msk [vmem:[%s3497_s4 + $0x8] sm:$0xff] %vm71_vm0, %v1459_v38  ;;  %v1614_v62 = vadd.f32 %v1931_v17, %v1613_v32  ;;  %v1635_v30 = vadd.f32 %v1932_v18, %v1634_v47  ;;  %v1743_v44 = vpack.c.bf16 %v1932_v18, %v1931_v17  ;;  %v2032_v38 = vld [vmem:[%s3493_s0 + $0x18] sm:$0xff] }
 0x29d   :  { %v1933_v56 = vsel %vm1025_vm2, 1.0, %v2097_v35  ;;  %2000 = vmatmul.msk.f32.gmra.mxu2 %vm1025_vm2, %v2098_v21  ;;  %v1934_v8 = vsel %vm1026_vm3, 1.0, %v2097_v35  ;;  %2016 = vmatmul.msk.f32.gmra.mxu3 %vm1026_vm3, %v2098_v21  ;;  %v882_v51 = vpop.xlane.xlu0 %881  ;;  %v925_v52 = vshll.u32 %v924_v5, 16 }
 0x29e   :  { %1775 = vst [vmem:[#allocation2 + $0x90] sm:$0xff] %v1743_v44  ;;  %v1656_v48 = vadd.f32 %v1933_v56, %v1655_v46  ;;  %v1677_v42 = vadd.f32 %v1934_v8, %v1676_v53  ;;  %v1744_v50 = vpack.c.bf16 %v1934_v8, %v1933_v56  ;;  %v883_v34 = vcvt.f32.s32 %v882_v51 }
 0x29f   :  { %v1396_v57 = vpop.f32.mrf.mxu2  ;;  %v1520_v27 = vmul.f32 %v1504_v49, %v1504_v49 }
 0x2a0   :  { %1776 = vst [vmem:[#allocation2 + $0x98] sm:$0xff] %v1744_v50  ;;  %v886_v1 = vadd.s32 %v885_v3, %v883_v34  ;;  %v1397_v61 = vadd.f32 %v1396_v57, %v1332_v29  ;;  %v1461_v40 = vpop.f32.mrf.mxu3  ;;  %v1269_v26 = vpop.f32.mrf.mxu0 }
 0x2a1   :  { %v1334_v55 = vpop.f32.mrf.mxu1  ;;  %v1538_v25 = vsel %vm71_vm0, %v1520_v27, 0.0 }
 0x2a2   :  { %v1462_v24 = vadd.f32 %v1461_v40, %v1397_v61  ;;  %1539 = vadd.xlane.f32.xlu1 %v1538_v25  ;;  %vm1027_vm4 = vcmp.eq.s32.totalorder %v2491_v39, %v886_v1  ;;  %vm1028_vm5 = vcmp.eq.s32.totalorder %v2494_v43, %v886_v1  ;;  %vm1029_vm6 = vcmp.eq.s32.totalorder %v2497_v54, %v886_v1 }
 0x2a3   :  { %v1935_v41 = vsel %vm1027_vm4, 1.0, %v2097_v35  ;;  %1969 = vmatmul.msk.f32.gmra.mxu0 %vm1027_vm4, %v2098_v21  ;;  %v1936_v60 = vsel %vm1028_vm5, 1.0, %v2097_v35  ;;  %1985 = vmatmul.msk.f32.gmra.mxu1 %vm1028_vm5, %v2098_v21  ;;  %vm1030_vm7 = vcmp.eq.s32.totalorder %v2505_v0, %v886_v1  ;;  %v1335_v46 = vadd.f32 %v1334_v55, %v1269_v26 }
 0x2a4   :  { %v1505_v7 = vsub.f32 %v1462_v24, %v2031_v11  ;;  %1711 = vst.msk [vmem:[%s3497_s4 + $0x10] sm:$0xff] %vm71_vm0, %v1462_v24  ;;  %v1615_v28 = vadd.f32 %v1935_v41, %v1614_v62  ;;  %v1636_v32 = vadd.f32 %v1936_v60, %v1635_v30  ;;  %v1745_v47 = vpack.c.bf16 %v1936_v60, %v1935_v41 }
 0x2a5   :  { %v1937_v16 = vsel %vm1029_vm6, 1.0, %v2097_v35  ;;  %2001 = vmatmul.msk.f32.gmra.mxu2 %vm1029_vm6, %v2098_v21  ;;  %v1938_v12 = vsel %vm1030_vm7, 1.0, %v2097_v35  ;;  %2017 = vmatmul.msk.f32.gmra.mxu3 %vm1030_vm7, %v2098_v21  ;;  %v902_v13 = vpop.xlane.xlu1 %901  ;;  %v944_v62 = vcvt.f32.s32 %v3217_v2 }
 0x2a6   :  { %1777 = vst [vmem:[#allocation2 + $0xa0] sm:$0xff] %v1745_v47  ;;  %v1657_v58 = vadd.f32 %v1937_v16, %v1656_v48  ;;  %v1678_v6 = vadd.f32 %v1938_v12, %v1677_v42  ;;  %v1746_v36 = vpack.c.bf16 %v1938_v12, %v1937_v16  ;;  %v903_v53 = vcvt.f32.s32 %v902_v13 }
 0x2a7   :  { %v1399_v37 = vpop.f32.mrf.mxu2  ;;  %v1521_v14 = vmul.f32 %v1505_v7, %v1505_v7  ;;  %v945_v40 = vshll.u32 %v944_v62, 16  ;;  %v964_v7 = vcvt.f32.s32 %v3234_v19 }
 0x2a8   :  { %1778 = vst [vmem:[#allocation2 + $0xa8] sm:$0xff] %v1746_v36  ;;  %v906_v31 = vadd.s32 %v905_v20, %v903_v53  ;;  %v1400_v22 = vadd.f32 %v1399_v37, %v1335_v46  ;;  %v1464_v23 = vpop.f32.mrf.mxu3  ;;  %v1272_v4 = vpop.f32.mrf.mxu0  ;;  %v2033_v20 = vld [vmem:[%s3493_s0 + $0x20] sm:$0xff] }
 0x2a9   :  { %v1337_v59 = vpop.f32.mrf.mxu1  ;;  %v1541_v63 = vsel %vm71_vm0, %v1521_v14, 0.0 }
 0x2aa   :  { %v1465_v33 = vadd.f32 %v1464_v23, %v1400_v22  ;;  %1542 = vadd.xlane.f32.xlu2 %v1541_v63  ;;  %vm1031_vm8 = vcmp.eq.s32.totalorder %v2491_v39, %v906_v31  ;;  %vm1032_vm9 = vcmp.eq.s32.totalorder %v2494_v43, %v906_v31  ;;  %vm1033_vm10 = vcmp.eq.s32.totalorder %v2497_v54, %v906_v31  ;;  %v2034_v63 = vld [vmem:[%s3493_s0 + $0x28] sm:$0xff] }
 0x2ab   :  { %v1939_v45 = vsel %vm1031_vm8, 1.0, %v2097_v35  ;;  %1970 = vmatmul.msk.f32.gmra.mxu0 %vm1031_vm8, %v2098_v21  ;;  %v1940_v3 = vsel %vm1032_vm9, 1.0, %v2097_v35  ;;  %1986 = vmatmul.msk.f32.gmra.mxu1 %vm1032_vm9, %v2098_v21  ;;  %vm1034_vm11 = vcmp.eq.s32.totalorder %v2505_v0, %v906_v31  ;;  %v1338_v30 = vadd.f32 %v1337_v59, %v1272_v4 }
 0x2ac   :  { %v1506_v17 = vsub.f32 %v1465_v33, %v2032_v38  ;;  %1712 = vst.msk [vmem:[%s3497_s4 + $0x18] sm:$0xff] %vm71_vm0, %v1465_v33  ;;  %v1616_v18 = vadd.f32 %v1939_v45, %v1615_v28  ;;  %v1637_v15 = vadd.f32 %v1940_v3, %v1636_v32  ;;  %v1747_v49 = vpack.c.bf16 %v1940_v3, %v1939_v45 }
 0x2ad   :  { %v1941_v44 = vsel %vm1033_vm10, 1.0, %v2097_v35  ;;  %2002 = vmatmul.msk.f32.gmra.mxu2 %vm1033_vm10, %v2098_v21  ;;  %v1942_v10 = vsel %vm1034_vm11, 1.0, %v2097_v35  ;;  %2018 = vmatmul.msk.f32.gmra.mxu3 %vm1034_vm11, %v2098_v21  ;;  %v922_v29 = vpop.xlane.xlu2 %921  ;;  %v965_v22 = vshll.u32 %v964_v7, 16 }
 0x2ae   :  { %1779 = vst [vmem:[#allocation2 + $0xb0] sm:$0xff] %v1747_v49  ;;  %v1658_v56 = vadd.f32 %v1941_v44, %v1657_v58  ;;  %v1679_v8 = vadd.f32 %v1942_v10, %v1678_v6  ;;  %v1748_v51 = vpack.c.bf16 %v1942_v10, %v1941_v44  ;;  %v923_v48 = vcvt.f32.s32 %v922_v29 }
 0x2af   :  { %v1402_v42 = vpop.f32.mrf.mxu2  ;;  %v1522_v50 = vmul.f32 %v1506_v17, %v1506_v17 }
 0x2b0   :  { %1780 = vst [vmem:[#allocation2 + $0xb8] sm:$0xff] %v1748_v51  ;;  %v926_v34 = vadd.s32 %v925_v52, %v923_v48  ;;  %v1403_v2 = vadd.f32 %v1402_v42, %v1338_v30  ;;  %v1467_v57 = vpop.f32.mrf.mxu3  ;;  %v1275_v27 = vpop.f32.mrf.mxu0 }
 0x2b1   :  { %v1340_v1 = vpop.f32.mrf.mxu1  ;;  %v1544_v61 = vsel %vm71_vm0, %v1522_v50, 0.0 }
 0x2b2   :  { %v1468_v26 = vadd.f32 %v1467_v57, %v1403_v2  ;;  %1545 = vadd.xlane.f32.xlu0 %v1544_v61  ;;  %vm1035_vm12 = vcmp.eq.s32.totalorder %v2491_v39, %v926_v34  ;;  %vm1036_vm13 = vcmp.eq.s32.totalorder %v2494_v43, %v926_v34  ;;  %vm1037_vm14 = vcmp.eq.s32.totalorder %v2497_v54, %v926_v34 }
 0x2b3   :  { %v1943_v55 = vsel %vm1035_vm12, 1.0, %v2097_v35  ;;  %1971 = vmatmul.msk.f32.gmra.mxu0 %vm1035_vm12, %v2098_v21  ;;  %v1944_v25 = vsel %vm1036_vm13, 1.0, %v2097_v35  ;;  %1987 = vmatmul.msk.f32.gmra.mxu1 %vm1036_vm13, %v2098_v21  ;;  %vm1038_vm15 = vcmp.eq.s32.totalorder %v2505_v0, %v926_v34  ;;  %v1341_v28 = vadd.f32 %v1340_v1, %v1275_v27 }
 0x2b4   :  { %v1507_v24 = vsub.f32 %v1468_v26, %v2033_v20  ;;  %1713 = vst.msk [vmem:[%s3497_s4 + $0x20] sm:$0xff] %vm71_vm0, %v1468_v26  ;;  %v1617_v41 = vadd.f32 %v1943_v55, %v1616_v18  ;;  %v1638_v60 = vadd.f32 %v1944_v25, %v1637_v15  ;;  %v1749_v11 = vpack.c.bf16 %v1944_v25, %v1943_v55  ;;  %v2035_v26 = vld [vmem:[%s3493_s0 + $0x30] sm:$0xff] }
 0x2b5   :  { %v1945_v32 = vsel %vm1037_vm14, 1.0, %v2097_v35  ;;  %2003 = vmatmul.msk.f32.gmra.mxu2 %vm1037_vm14, %v2098_v21  ;;  %v1946_v47 = vsel %vm1038_vm15, 1.0, %v2097_v35  ;;  %2019 = vmatmul.msk.f32.gmra.mxu3 %vm1038_vm15, %v2098_v21  ;;  %v942_v5 = vpop.xlane.xlu0 %941  ;;  %vm1697_vm13 = vcmask 1040384   ;;  %vm1699_vm14 = vcmask 1042434  }
 0x2b6   :  { %1781 = vst [vmem:[#allocation2 + $0xc0] sm:$0xff] %v1749_v11  ;;  %v1659_v46 = vadd.f32 %v1945_v32, %v1658_v56  ;;  %v1680_v16 = vadd.f32 %v1946_v47, %v1679_v8  ;;  %v1750_v12 = vpack.c.bf16 %v1946_v47, %v1945_v32  ;;  %v943_v13 = vcvt.f32.s32 %v942_v5 }
 0x2b7   :  { %v1405_v58 = vpop.f32.mrf.mxu2  ;;  %v1523_v6 = vmul.f32 %v1507_v24, %v1507_v24  ;;  %vm1701_vm15 = vcmask 1041408  }
 0x2b8   :  { %1782 = vst [vmem:[#allocation2 + $0xc8] sm:$0xff] %v1750_v12  ;;  %v946_v36 = vadd.s32 %v945_v40, %v943_v13  ;;  %v1406_v19 = vadd.f32 %v1405_v58, %v1341_v28  ;;  %v1470_v53 = vpop.f32.mrf.mxu3  ;;  %v1278_v14 = vpop.f32.mrf.mxu0  ;;  %v984_v58 = vcvt.f32.s32 %v3261_v9 }
 0x2b9   :  { %v1547_v37 = vsel %vm71_vm0, %v1523_v6, 0.0  ;;  %v1343_v31 = vpop.f32.mrf.mxu1 }
 0x2ba   :  { %v1471_v23 = vadd.f32 %v1470_v53, %v1406_v19  ;;  %1548 = vadd.xlane.f32.xlu1 %v1547_v37  ;;  %vm1039_vm1 = vcmp.eq.s32.totalorder %v2491_v39, %v946_v36  ;;  %vm1040_vm2 = vcmp.eq.s32.totalorder %v2494_v43, %v946_v36  ;;  %vm1041_vm3 = vcmp.eq.s32.totalorder %v2497_v54, %v946_v36 }
 0x2bb   :  { %v1947_v4 = vsel %vm1039_vm1, 1.0, %v2097_v35  ;;  %1972 = vmatmul.msk.f32.gmra.mxu0 %vm1039_vm1, %v2098_v21  ;;  %v1948_v59 = vsel %vm1040_vm2, 1.0, %v2097_v35  ;;  %1988 = vmatmul.msk.f32.gmra.mxu1 %vm1040_vm2, %v2098_v21  ;;  %vm1042_vm4 = vcmp.eq.s32.totalorder %v2505_v0, %v946_v36  ;;  %v1344_v17 = vadd.f32 %v1343_v31, %v1278_v14 }
 0x2bc   :  { %v1508_v52 = vsub.f32 %v1471_v23, %v2034_v63  ;;  %1714 = vst.msk [vmem:[%s3497_s4 + $0x28] sm:$0xff] %vm71_vm0, %v1471_v23  ;;  %v1618_v33 = vadd.f32 %v1947_v4, %v1617_v41  ;;  %v1639_v45 = vadd.f32 %v1948_v59, %v1638_v60  ;;  %v1751_v3 = vpack.c.bf16 %v1948_v59, %v1947_v4  ;;  %v962_v38 = vpop.xlane.xlu1 %961 }
 0x2bd   :  { %v1949_v18 = vsel %vm1041_vm3, 1.0, %v2097_v35  ;;  %2004 = vmatmul.msk.f32.gmra.mxu2 %vm1041_vm3, %v2098_v21  ;;  %v1950_v15 = vsel %vm1042_vm4, 1.0, %v2097_v35  ;;  %2020 = vmatmul.msk.f32.gmra.mxu3 %vm1042_vm4, %v2098_v21  ;;  %v963_v49 = vcvt.f32.s32 %v962_v38  ;;  %v985_v36 = vshll.u32 %v984_v58, 16 }
 0x2be   :  { %1783 = vst [vmem:[#allocation2 + $0xd0] sm:$0xff] %v1751_v3  ;;  %v1660_v62 = vadd.f32 %v1949_v18, %v1659_v46  ;;  %v1681_v30 = vadd.f32 %v1950_v15, %v1680_v16  ;;  %v1752_v44 = vpack.c.bf16 %v1950_v15, %v1949_v18  ;;  %v1524_v10 = vmul.f32 %v1508_v52, %v1508_v52  ;;  %v2036_v46 = vld [vmem:[%s3493_s0 + $0x38] sm:$0xff] }
 0x2bf   :  { %v966_v29 = vadd.s32 %v965_v22, %v963_v49  ;;  %v1408_v56 = vpop.f32.mrf.mxu2 }
 0x2c0   :  { %1784 = vst [vmem:[#allocation2 + $0xd8] sm:$0xff] %v1752_v44  ;;  %v1409_v8 = vadd.f32 %v1408_v56, %v1344_v17  ;;  %v1473_v51 = vpop.f32.mrf.mxu3  ;;  %v1550_v48 = vsel %vm71_vm0, %v1524_v10, 0.0  ;;  %v1281_v2 = vpop.f32.mrf.mxu0 }
 0x2c1   :  { %1551 = vadd.xlane.f32.xlu2 %v1550_v48  ;;  %vm1043_vm5 = vcmp.eq.s32.totalorder %v2491_v39, %v966_v29  ;;  %vm1044_vm6 = vcmp.eq.s32.totalorder %v2494_v43, %v966_v29  ;;  %vm1045_vm7 = vcmp.eq.s32.totalorder %v2497_v54, %v966_v29  ;;  %vm1046_vm8 = vcmp.eq.s32.totalorder %v2505_v0, %v966_v29  ;;  %v1346_v57 = vpop.f32.mrf.mxu1 }
 0x2c2   :  { %v1474_v42 = vadd.f32 %v1473_v51, %v1409_v8  ;;  %v1951_v50 = vsel %vm1043_vm5, 1.0, %v2097_v35  ;;  %v1952_v34 = vsel %vm1044_vm6, 1.0, %v2097_v35  ;;  %v1953_v40 = vsel %vm1045_vm7, 1.0, %v2097_v35 }
 0x2c3   :  { %1973 = vmatmul.msk.f32.gmra.mxu0 %vm1043_vm5, %v2098_v21  ;;  %v1619_v27 = vadd.f32 %v1951_v50, %v1618_v33  ;;  %1989 = vmatmul.msk.f32.gmra.mxu1 %vm1044_vm6, %v2098_v21  ;;  %v1640_v1 = vadd.f32 %v1952_v34, %v1639_v45  ;;  %v1753_v61 = vpack.c.bf16 %v1952_v34, %v1951_v50  ;;  %v1954_v20 = vsel %vm1046_vm8, 1.0, %v2097_v35  ;;  %v2037_v50 = vld [vmem:[%s3493_s0 + $0x40] sm:$0xff] }
 0x2c4   :  { %v1509_v55 = vsub.f32 %v1474_v42, %v2035_v26  ;;  %1715 = vst.msk [vmem:[%s3497_s4 + $0x30] sm:$0xff] %vm71_vm0, %v1474_v42  ;;  %v1661_v25 = vadd.f32 %v1953_v40, %v1660_v62  ;;  %v1682_v24 = vadd.f32 %v1954_v20, %v1681_v30  ;;  %v1754_v41 = vpack.c.bf16 %v1954_v20, %v1953_v40 }
 0x2c5   :  { %1785 = vst [vmem:[#allocation2 + $0xe0] sm:$0xff] %v1753_v61  ;;  %2005 = vmatmul.msk.f32.gmra.mxu2 %vm1045_vm7, %v2098_v21  ;;  %2021 = vmatmul.msk.f32.gmra.mxu3 %vm1046_vm8, %v2098_v21  ;;  %v1347_v60 = vadd.f32 %v1346_v57, %v1281_v2 }
 0x2c6   :  { %v1525_v11 = vmul.f32 %v1509_v55, %v1509_v55  ;;  %1786 = vst [vmem:[#allocation2 + $0xe8] sm:$0xff] %v1754_v41 }
 0x2c7   :  { %v1411_v7 = vpop.f32.mrf.mxu2 }
 0x2c8   :  { %v1412_v28 = vadd.f32 %v1411_v7, %v1347_v60  ;;  %v1553_v32 = vsel %vm71_vm0, %v1525_v11, 0.0  ;;  %v1476_v47 = vpop.f32.mrf.mxu3 }
 0x2c9   :  { %1554 = vadd.xlane.f32.xlu0 %v1553_v32 }
 0x2ca   :  { %v1477_v5 = vadd.f32 %v1476_v47, %v1412_v28 }
 0x2cc   :  { %v1510_v16 = vsub.f32 %v1477_v5, %v2036_v46  ;;  %1716 = vst.msk [vmem:[%s3497_s4 + $0x38] sm:$0xff] %vm71_vm0, %v1477_v5 }
 0x2ce   :  { %v1526_v12 = vmul.f32 %v1510_v16, %v1510_v16 }
 0x2d0   :  { %v1556_v13 = vsel %vm71_vm0, %v1526_v12, 0.0 }
 0x2d1   :  { %1557 = vadd.xlane.f32.xlu1 %v1556_v13  ;;  %v3502_v13 = vlaneseq }
 0x2d3   :  { %vm1706_vm1 = vcmp.lt.s32.totalorder %v3502_v13, 512 }
 0x30b   :  { %v982_v6 = vpop.xlane.xlu2 %981 }
 0x30c   :  { %v983_v19 = vcvt.f32.s32 %v982_v6  ;;  %v2038_v6 = vld [vmem:[%s3493_s0 + $0x48] sm:$0xff] }
 0x30e   :  { %v986_v53 = vadd.s32 %v985_v36, %v983_v19 }
 0x310   :  { %v1284_v37 = vpop.f32.mrf.mxu0  ;;  %v1349_v14 = vpop.f32.mrf.mxu1  ;;  %vm1047_vm9 = vcmp.eq.s32.totalorder %v2491_v39, %v986_v53  ;;  %vm1048_vm10 = vcmp.eq.s32.totalorder %v2494_v43, %v986_v53  ;;  %vm1049_vm11 = vcmp.eq.s32.totalorder %v2497_v54, %v986_v53  ;;  %vm1050_vm12 = vcmp.eq.s32.totalorder %v2505_v0, %v986_v53 }
 0x311   :  { %v1955_v31 = vsel %vm1047_vm9, 1.0, %v2097_v35  ;;  %1974 = vmatmul.msk.f32.gmra.mxu0 %vm1047_vm9, %v2098_v21  ;;  %v1956_v22 = vsel %vm1048_vm10, 1.0, %v2097_v35  ;;  %1990 = vmatmul.msk.f32.gmra.mxu1 %vm1048_vm10, %v2098_v21  ;;  %v1957_v9 = vsel %vm1049_vm11, 1.0, %v2097_v35  ;;  %v1958_v43 = vsel %vm1050_vm12, 1.0, %v2097_v35 }
 0x312   :  { %v1620_v23 = vadd.f32 %v1955_v31, %v1619_v27  ;;  %v1641_v4 = vadd.f32 %v1956_v22, %v1640_v1  ;;  %v1755_v59 = vpack.c.bf16 %v1956_v22, %v1955_v31  ;;  %2006 = vmatmul.msk.f32.gmra.mxu2 %vm1049_vm11, %v2098_v21  ;;  %v1662_v39 = vadd.f32 %v1957_v9, %v1661_v25 }
 0x313   :  { %2022 = vmatmul.msk.f32.gmra.mxu3 %vm1050_vm12, %v2098_v21  ;;  %v1683_v33 = vadd.f32 %v1958_v43, %v1682_v24  ;;  %v1350_v45 = vadd.f32 %v1349_v14, %v1284_v37  ;;  %v1756_v3 = vpack.c.bf16 %v1958_v43, %v1957_v9 }
 0x314   :  { %v1621_v54 = vrot.slane %v1620_v23, 4  ;;  %v1642_v63 = vrot.slane %v1641_v4, 4  ;;  %1787 = vst [vmem:[#allocation2 + $0xf0] sm:$0xff] %v1755_v59  ;;  %v1663_v52 = vrot.slane %v1662_v39, 4 }
 0x315   :  { %v1684_v18 = vrot.slane %v1683_v33, 4  ;;  %1788 = vst [vmem:[#allocation2 + $0xf8] sm:$0xff] %v1756_v3 }
 0x316   :  { %v1622_v38 = vadd.f32 %v1621_v54, %v1620_v23  ;;  %v1643_v17 = vadd.f32 %v1642_v63, %v1641_v4  ;;  %v1664_v0 = vadd.f32 %v1663_v52, %v1662_v39  ;;  %v2039_v39 = vld [vmem:[%s3493_s0 + $0x50] sm:$0xff] }
 0x317   :  { %v1414_v15 = vpop.f32.mrf.mxu2  ;;  %v1685_v21 = vadd.f32 %v1684_v18, %v1683_v33  ;;  %v2040_v18 = vld [vmem:[%s3493_s0 + $0x58] sm:$0xff] }
 0x318   :  { %v1415_v49 = vadd.f32 %v1414_v15, %v1350_v45  ;;  %v1479_v62 = vpop.f32.mrf.mxu3  ;;  %v1287_v30 = vpop.f32.mrf.mxu0  ;;  %v1623_v44 = vrot.slane %v1622_v38, 2  ;;  %v1644_v35 = vrot.slane %v1643_v17, 2  ;;  %v1665_v10 = vrot.slane %v1664_v0, 2 }
 0x319   :  { %v1352_v29 = vpop.f32.mrf.mxu1  ;;  %v1686_v42 = vrot.slane %v1685_v21, 2 }
 0x31a   :  { %v1480_v56 = vadd.f32 %v1479_v62, %v1415_v49  ;;  %v1624_v8 = vadd.f32 %v1623_v44, %v1622_v38  ;;  %v1645_v51 = vadd.f32 %v1644_v35, %v1643_v17  ;;  %v1666_v48 = vadd.f32 %v1665_v10, %v1664_v0 }
 0x31b   :  { %v1687_v1 = vadd.f32 %v1686_v42, %v1685_v21  ;;  %v1353_v25 = vadd.f32 %v1352_v29, %v1287_v30 }
 0x31c   :  { %v1511_v34 = vsub.f32 %v1480_v56, %v2037_v50  ;;  %1717 = vst.msk [vmem:[%s3497_s4 + $0x40] sm:$0xff] %vm71_vm0, %v1480_v56  ;;  %v1625_v2 = vrot.slane %v1624_v8, 1  ;;  %v1646_v57 = vrot.slane %v1645_v51, 1  ;;  %v1667_v27 = vrot.slane %v1666_v48, 1 }
 0x31d   :  { %v1688_v55 = vrot.slane %v1687_v1, 1 }
 0x31e   :  { %v1527_v61 = vmul.f32 %v1511_v34, %v1511_v34  ;;  %v1647_v40 = vadd.f32 %v1646_v57, %v1645_v51  ;;  %v1668_v26 = vadd.f32 %v1667_v27, %v1666_v48  ;;  %v1626_v20 = vadd.f32 %v1625_v2, %v1624_v8  ;;  %v2041_v8 = vld [vmem:[%s3493_s0 + $0x60] sm:$0xff] }
 0x31f   :  { %v1689_v28 = vadd.f32 %v1688_v55, %v1687_v1 }
 0x320   :  { %v1417_v24 = vpop.f32.mrf.mxu2  ;;  %v1482_v41 = vpop.f32.mrf.mxu3  ;;  %v1559_v60 = vsel %vm71_vm0, %v1527_v61, 0.0  ;;  %v1694_v11 = vrot.slane %v1647_v40, 7  ;;  %v1695_v7 = vrot.slane %v1668_v26, 6  ;;  %v2042_v40 = vld [vmem:[%s3493_s0 + $0x68] sm:$0xff] }
 0x321   :  { %v1418_v32 = vadd.f32 %v1417_v24, %v1353_v25  ;;  %1560 = vadd.xlane.f32.xlu2 %v1559_v60  ;;  %v1290_v47 = vpop.f32.mrf.mxu0  ;;  %v1355_v5 = vpop.f32.mrf.mxu1  ;;  %v1696_v16 = vrot.slane %v1689_v28, 5 }
 0x322   :  { %v1698_v46 = vsel %vm1697_vm13, %v1626_v20, %v1694_v11  ;;  %v1356_v53 = vadd.f32 %v1355_v5, %v1290_v47 }
 0x323   :  { %v1483_v12 = vadd.f32 %v1482_v41, %v1418_v32  ;;  %v1700_v58 = vsel %vm1699_vm14, %v1695_v7, %v1696_v16  ;;  %v2043_v7 = vld [vmem:[%s3493_s0 + $0x70] sm:$0xff] }
 0x324   :  { %v1702_v19 = vsel %vm1701_vm15, %v1698_v46, %v1700_v58 }
 0x325   :  { %v1512_v36 = vsub.f32 %v1483_v12, %v2038_v6  ;;  %1718 = vst.msk [vmem:[%s3497_s4 + $0x48] sm:$0xff] %vm71_vm0, %v1483_v12 }
 0x326   :  { %1708 = vst.msk [vmem:[%s3500_s7] sm:$0xf] %vm1706_vm1, %v1702_v19 }
 0x327   :  { %v1528_v37 = vmul.f32 %v1512_v36, %v1512_v36  ;;  %v2044_v36 = vld [vmem:[%s3493_s0 + $0x78] sm:$0xff]  ;;  %s2101_s0 = smov 16  }
 0x328   :  { %v1420_v14 = vpop.f32.mrf.mxu2  ;;  %v1485_v31 = vpop.f32.mrf.mxu3  ;;  %1803 = dma.vmem_to_hbm [thread:$0]  %s1796_s22, 4096, %s1798_s3, [#allocation3], %s2100_s2, %s2100_s2, %s2101_s0  }
 0x329   :  { %v1421_v22 = vadd.f32 %v1420_v14, %v1356_v53  ;;  %v1562_v9 = vsel %vm71_vm0, %v1528_v37, 0.0  ;;  %v1293_v23 = vpop.f32.mrf.mxu0  ;;  %v1358_v4 = vpop.f32.mrf.mxu1 }
 0x32a   :  { %1563 = vadd.xlane.f32.xlu0 %v1562_v9  ;;  %v1359_v54 = vadd.f32 %v1358_v4, %v1293_v23  ;;  %v1537_v14 = vpop.xlane.xlu0 %1536 }
 0x32b   :  { %v1486_v59 = vadd.f32 %v1485_v31, %v1421_v22  ;;  %v1540_v31 = vpop.xlane.xlu1 %1539  ;;  %v1543_v22 = vpop.xlane.xlu2 %1542 }
 0x32d   :  { %v1513_v43 = vsub.f32 %v1486_v59, %v2039_v39  ;;  %1719 = vst.msk [vmem:[%s3497_s4 + $0x50] sm:$0xff] %vm71_vm0, %v1486_v59  ;;  %v1583_v59 = vadd.f32 %v1540_v31, %v1537_v14 }
 0x32f   :  { %v1529_v63 = vmul.f32 %v1513_v43, %v1513_v43  ;;  %v1584_v39 = vadd.f32 %v1583_v59, %v1543_v22 }
 0x330   :  { %v1423_v52 = vpop.f32.mrf.mxu2  ;;  %v1488_v33 = vpop.f32.mrf.mxu3 }
 0x331   :  { %v1424_v45 = vadd.f32 %v1423_v52, %v1359_v54  ;;  %v1565_v3 = vsel %vm71_vm0, %v1529_v63, 0.0  ;;  %v1296_v38 = vpop.f32.mrf.mxu0  ;;  %v1361_v17 = vpop.f32.mrf.mxu1 }
 0x332   :  { %1566 = vadd.xlane.f32.xlu1 %v1565_v3  ;;  %v1362_v49 = vadd.f32 %v1361_v17, %v1296_v38  ;;  %v1546_v9 = vpop.xlane.xlu0 %1545 }
 0x333   :  { %v1489_v0 = vadd.f32 %v1488_v33, %v1424_v45  ;;  %v1549_v23 = vpop.xlane.xlu1 %1548  ;;  %v1585_v54 = vadd.f32 %v1584_v39, %v1546_v9 }
 0x334   :  { %v1552_v4 = vpop.xlane.xlu2 %1551 }
 0x335   :  { %v1514_v15 = vsub.f32 %v1489_v0, %v2040_v18  ;;  %1720 = vst.msk [vmem:[%s3497_s4 + $0x58] sm:$0xff] %vm71_vm0, %v1489_v0  ;;  %v1586_v52 = vadd.f32 %v1585_v54, %v1549_v23 }
 0x337   :  { %v1530_v62 = vmul.f32 %v1514_v15, %v1514_v15  ;;  %v1587_v45 = vadd.f32 %v1586_v52, %v1552_v4 }
 0x338   :  { %v1426_v30 = vpop.f32.mrf.mxu2  ;;  %v1491_v44 = vpop.f32.mrf.mxu3 }
 0x339   :  { %v1427_v35 = vadd.f32 %v1426_v30, %v1362_v49  ;;  %v1568_v10 = vsel %vm71_vm0, %v1530_v62, 0.0  ;;  %v1364_v21 = vpop.f32.mrf.mxu1  ;;  %v1299_v29 = vpop.f32.mrf.mxu0 }
 0x33a   :  { %1569 = vadd.xlane.f32.xlu2 %v1568_v10  ;;  %v1365_v48 = vadd.f32 %v1364_v21, %v1299_v29 }
 0x33b   :  { %v1492_v56 = vadd.f32 %v1491_v44, %v1427_v35 }
 0x33c   :  { %v1555_v43 = vpop.xlane.xlu0 %1554 }
 0x33d   :  { %v1515_v51 = vsub.f32 %v1492_v56, %v2041_v8  ;;  %1721 = vst.msk [vmem:[%s3497_s4 + $0x60] sm:$0xff] %vm71_vm0, %v1492_v56  ;;  %v1588_v3 = vadd.f32 %v1587_v45, %v1555_v43 }
 0x33f   :  { %v1531_v42 = vmul.f32 %v1515_v51, %v1515_v51 }
 0x340   :  { %v1429_v50 = vpop.f32.mrf.mxu2  ;;  %v1494_v34 = vpop.f32.mrf.mxu3 }
 0x341   :  { %v1430_v2 = vadd.f32 %v1429_v50, %v1365_v48  ;;  %v1571_v57 = vsel %vm71_vm0, %v1531_v42, 0.0  ;;  %v1302_v1 = vpop.f32.mrf.mxu0  ;;  %v1367_v61 = vpop.f32.mrf.mxu1 }
 0x342   :  { %1572 = vadd.xlane.f32.xlu0 %v1571_v57  ;;  %v1368_v55 = vadd.f32 %v1367_v61, %v1302_v1 }
 0x343   :  { %v1495_v27 = vadd.f32 %v1494_v34, %v1430_v2 }
 0x344   :  { %v1558_v63 = vpop.xlane.xlu1 %1557 }
 0x345   :  { %v1516_v26 = vsub.f32 %v1495_v27, %v2042_v40  ;;  %1722 = vst.msk [vmem:[%s3497_s4 + $0x68] sm:$0xff] %vm71_vm0, %v1495_v27  ;;  %v1589_v17 = vadd.f32 %v1588_v3, %v1558_v63 }
 0x347   :  { %v1532_v25 = vmul.f32 %v1516_v26, %v1516_v26 }
 0x348   :  { %v1432_v20 = vpop.f32.mrf.mxu2  ;;  %v1497_v60 = vpop.f32.mrf.mxu3 }
 0x349   :  { %v1433_v24 = vadd.f32 %v1432_v20, %v1368_v55  ;;  %v1574_v41 = vsel %vm71_vm0, %v1532_v25, 0.0 }
 0x34a   :  { %1575 = vadd.xlane.f32.xlu1 %v1574_v41 }
 0x34b   :  { %v1498_v11 = vadd.f32 %v1497_v60, %v1433_v24 }
 0x34d   :  { %v1517_v28 = vsub.f32 %v1498_v11, %v2043_v7  ;;  %1723 = vst.msk [vmem:[%s3497_s4 + $0x70] sm:$0xff] %vm71_vm0, %v1498_v11 }
 0x34f   :  { %v1533_v32 = vmul.f32 %v1517_v28, %v1517_v28 }
 0x351   :  { %v1577_v47 = vsel %vm71_vm0, %v1533_v32, 0.0 }
 0x352   :  { %1578 = vadd.xlane.f32.xlu2 %v1577_v47 }
 0x38e   :  { %v1305_v5 = vpop.f32.mrf.mxu0  ;;  %v1370_v46 = vpop.f32.mrf.mxu1 }
 0x38f   :  { %v1371_v16 = vadd.f32 %v1370_v46, %v1305_v5 }
 0x394   :  { %v1561_v33 = vpop.xlane.xlu2 %1560 }
 0x395   :  { %v1435_v12 = vpop.f32.mrf.mxu2  ;;  %v1590_v18 = vadd.f32 %v1589_v17, %v1561_v33 }
 0x396   :  { %v1436_v13 = vadd.f32 %v1435_v12, %v1371_v16  ;;  %v1500_v58 = vpop.f32.mrf.mxu3 }
 0x398   :  { %v1501_v6 = vadd.f32 %v1500_v58, %v1436_v13 }
 0x39a   :  { %v1518_v19 = vsub.f32 %v1501_v6, %v2044_v36  ;;  %1724 = vst.msk [vmem:[%s3497_s4 + $0x78] sm:$0xff] %vm71_vm0, %v1501_v6  ;;  %s2102_s4 = smov [#allocation4]  }
 0x39b   :  { %s1809_s5 = sshll.u32 %s2102_s4, 4  ;;  %s1810_s5 = int_to_ptr.vmem [resolvable:$true] %s1809_s5 }
 0x39c   :  { %v1534_v53 = vmul.f32 %v1518_v19, %v1518_v19 }
 0x39d   :  { %v1564_v38 = vpop.xlane.xlu0 %1563 }
 0x39e   :  { %v1580_v37 = vsel %vm71_vm0, %v1534_v53, 0.0  ;;  %v1591_v49 = vadd.f32 %v1590_v18, %v1564_v38  ;;  %vm1604_vm0 = vcmask 0  }
 0x39f   :  { %1581 = vadd.xlane.f32.xlu0 %v1580_v37 }
 0x3a5   :  { %v1567_v0 = vpop.xlane.xlu1 %1566 }
 0x3a6   :  { %v1592_v62 = vadd.f32 %v1591_v49, %v1567_v0 }
 0x3ad   :  { %v1570_v15 = vpop.xlane.xlu2 %1569 }
 0x3ae   :  { %v1593_v44 = vadd.f32 %v1592_v62, %v1570_v15 }
 0x3b5   :  { %v1573_v30 = vpop.xlane.xlu0 %1572 }
 0x3b6   :  { %v1594_v10 = vadd.f32 %v1593_v44, %v1573_v30 }
 0x3bd   :  { %v1576_v35 = vpop.xlane.xlu1 %1575 }
 0x3be   :  { %v1595_v29 = vadd.f32 %v1594_v10, %v1576_v35 }
 0x3c5   :  { %v1579_v21 = vpop.xlane.xlu2 %1578 }
 0x3c6   :  { %v1596_v56 = vadd.f32 %v1595_v29, %v1579_v21 }
 0x412   :  { %v1582_v8 = vpop.xlane.xlu0 %1581 }
 0x413   :  { %v1597_v51 = vadd.f32 %v1596_v56, %v1582_v8 }
 0x415   :  { %v1598_v48 = vrot.slane %v1597_v51, 4 }
 0x417   :  { %v1599_v42 = vadd.f32 %v1598_v48, %v1597_v51 }
 0x419   :  { %v1600_v50 = vrot.slane %v1599_v42, 2 }
 0x41b   :  { %v1601_v34 = vadd.f32 %v1600_v50, %v1599_v42 }
 0x41d   :  { %v1602_v2 = vrot.slane %v1601_v34, 1 }
 0x41f   :  { %v1603_v57 = vadd.f32 %v1602_v2, %v1601_v34 }
 0x421   :  { %1605 = vst.msk [vmem:[#allocation4] sm:$0x1] %vm1604_vm0, %v1603_v57 }
 0x422   :  { %1814 = dma.vmem_to_hbm [thread:$0]  %s1810_s5, 16, %s1812_s24, [#allocation5]  }
 0x423   :  { %2093 = dma.done.wait [#allocation3], 4096  }
 0x424   :  { %2094 = vsyncadd [#allocation3], 4294963200 }
 0x425   :  { %2095 = dma.done.wait [#allocation5], 16  }
 0x426   :  { %2096 = vsyncadd [#allocation5], 4294967280 }
 0x427   :  { %1829 = vsyncpa [#allocation3], 1 }
 0x428   :  { %1830 = vsyncpa [#allocation5], 1 }

</bundles_post_ra>
